<compile_context>
chip_gen: v7x
topology: tpu7x:2x2x1
jax: 0.10.0
libtpu: 0.0.40
codegen_flags: <defaults>
</compile_context>

<pallas_src>
import functools

import numpy as np
import jax
import jax.numpy as jnp
from jax.experimental import pallas as pl
from jax.experimental.pallas import tpu as pltpu


def _round_up(x, m):
    return -(-x // m) * m


# ----------------------------------------------------------------------------
# Pallas kernel: fused (patches @ weight) + bias + activation, single shot.
# ----------------------------------------------------------------------------
def _fused_matmul_kernel(x_ref, w_ref, b_ref, o_ref, *, activation):
    acc = jnp.dot(x_ref[...], w_ref[...], preferred_element_type=jnp.float32)
    y = acc + b_ref[...]                       # f32 epilogue
    if activation == "relu":
        y = jnp.maximum(y, 0.0)
    elif activation == "tanh":
        y = jnp.tanh(y)
    o_ref[...] = y.astype(o_ref.dtype)


def fused_matmul(patches, w_mat, bias, activation, tm=128):
    """(M, K) bf16 @ (K, Nc) bf16 + bias (f32) -> activation -> bf16.

    No K grid: full K and N stay resident in VMEM.  The only grid axis tiles M
    and is marked "parallel" (megacore on v7x, future batch scaling).
    """
    M, K = patches.shape
    K2, Nc = w_mat.shape
    assert K == K2 and Nc % 128 == 0

    if M <= tm:
        tm_eff = _round_up(M, 16)              # bf16 sublane packing
        M_pad = tm_eff
    else:
        tm_eff = tm
        M_pad = _round_up(M, tm_eff)
    x = patches if M_pad == M else jnp.pad(patches, ((0, M_pad - M), (0, 0)))

    kernel = functools.partial(_fused_matmul_kernel, activation=activation)
    out = pl.pallas_call(
        kernel,
        out_shape=jax.ShapeDtypeStruct((M_pad, Nc), jnp.bfloat16),
        grid_spec=pltpu.PrefetchScalarGridSpec(
            num_scalar_prefetch=0,
            grid=(M_pad // tm_eff,),
            in_specs=[
                pl.BlockSpec((tm_eff, K), lambda m: (m, 0)),
                pl.BlockSpec((K, Nc), lambda m: (0, 0)),
                pl.BlockSpec((1, Nc), lambda m: (0, 0)),
            ],
            out_specs=pl.BlockSpec((tm_eff, Nc), lambda m: (m, 0)),
        ),
        compiler_params=pltpu.CompilerParams(
            dimension_semantics=("parallel",)),
    )(x, w_mat, bias)
    return out[:M]


# ----------------------------------------------------------------------------
# XLA glue: im2col patches, layer wrappers, depth-to-space.
# ----------------------------------------------------------------------------
def _im2col(x_nhwc, kh, kw, stride, pad):
    x = jnp.pad(x_nhwc, ((0, 0), (pad, pad), (pad, pad), (0, 0))) if pad else x_nhwc
    n, h, w, c = x.shape
    oh = (h - kh) // stride + 1
    ow = (w - kw) // stride + 1
    cols = []
    for i in range(kh):
        for j in range(kw):
            cols.append(x[:, i:i + oh * stride:stride,
                          j:j + ow * stride:stride, :])
    p = jnp.stack(cols, axis=3).reshape(n, oh, ow, kh * kw * c)
    return p.reshape(n * oh * ow, kh * kw * c), (n, oh, ow)


def conv2d(x_nhwc, layer, k, stride, pad, cout, activation):
    """Conv2d with prepacked weight (K, Cout_pad) bf16 and bias (1, Cout_pad) f32."""
    patches, (n, oh, ow) = _im2col(x_nhwc, k, k, stride, pad)
    y = fused_matmul(patches, layer["w"], layer["b"], activation)
    return y[:, :cout].reshape(n, oh, ow, cout)


def depth_to_space(y, cout):
    """(n, h, w, 4*cout) phase-major channels -> (n, 2h, 2w, cout)."""
    n, h, w, _ = y.shape
    y = y.reshape(n, h, w, 2, 2, cout)
    y = jnp.transpose(y, (0, 1, 3, 2, 4, 5))
    return y.reshape(n, 2 * h, 2 * w, cout)


# ----------------------------------------------------------------------------
# One-time parameter prepacking (runs eagerly at init, NOT per forward call).
# ----------------------------------------------------------------------------
def _pad_pack(wm, b):
    k, cout = wm.shape
    n_pad = _round_up(cout, 128)
    wm = np.pad(wm, ((0, 0), (0, n_pad - cout)))
    b = np.pad(b, ((0, n_pad - cout),)).reshape(1, n_pad)
    return {"w": jnp.asarray(wm, jnp.bfloat16), "b": jnp.asarray(b, jnp.float32)}


def _pack_conv(w_oihw, b):
    w = np.asarray(w_oihw, np.float32)         # (cout, cin, kh, kw)
    cout, cin, kh, kw = w.shape
    wm = np.transpose(w, (2, 3, 1, 0)).reshape(kh * kw * cin, cout)
    return _pad_pack(wm, np.asarray(b, np.float32))


# (phase, spatial_offset+1) -> tap index of the original 4-wide convT kernel
_TAP = {(0, 0): 3, (0, 1): 1, (1, 1): 2, (1, 2): 0}


def _pack_convT_subpixel(w_iohw, b):
    """ConvTranspose2d(k=4, s=2, p=1) == 3x3/s1/p1 conv with 4*cout outputs
    (phase-major channels) followed by depth_to_space.  Exact rearrangement."""
    w = np.asarray(w_iohw, np.float32)         # (cin, cout, 4, 4)
    cin, cout = w.shape[:2]
    k3 = np.zeros((3, 3, cin, 4 * cout), np.float32)
    for ph in (0, 1):
        for pw_ in (0, 1):
            oc = (ph * 2 + pw_) * cout
            for dy in range(3):
                a = _TAP.get((ph, dy))
                if a is None:
                    continue
                for dx in range(3):
                    bb = _TAP.get((pw_, dx))
                    if bb is None:
                        continue
                    k3[dy, dx, :, oc:oc + cout] = w[:, :, a, bb]
    wm = k3.reshape(9 * cin, 4 * cout)
    b4 = np.tile(np.asarray(b, np.float32), 4)
    return _pad_pack(wm, b4)


# ----------------------------------------------------------------------------
# Deterministic parameter init (PyTorch-default-style uniform bounds).
# ----------------------------------------------------------------------------
def _init_conv(key, cout, cin, kh, kw):
    kw_, kb_ = jax.random.split(key)
    bound = float(1.0 / np.sqrt(cin * kh * kw))
    w = jax.random.uniform(kw_, (cout, cin, kh, kw), jnp.float32, -bound, bound)
    b = jax.random.uniform(kb_, (cout,), jnp.float32, -bound, bound)
    return w, b


def _init_convT(key, cin, cout, kh, kw):
    kw_, kb_ = jax.random.split(key)
    bound = float(1.0 / np.sqrt(cin * kh * kw))
    w = jax.random.uniform(kw_, (cin, cout, kh, kw), jnp.float32, -bound, bound)
    b = jax.random.uniform(kb_, (cout,), jnp.float32, -bound, bound)
    return w, b


def init_unet_params(key):
    ks = jax.random.split(key, 6)
    return {
        "e1": _pack_conv(*_init_conv(ks[0], 64, 1, 4, 4)),
        "e2": _pack_conv(*_init_conv(ks[1], 128, 64, 4, 4)),
        "m1": _pack_conv(*_init_conv(ks[2], 128, 128, 3, 3)),
        "m2": _pack_conv(*_init_conv(ks[3], 128, 128, 3, 3)),
        "d1": _pack_convT_subpixel(*_init_convT(ks[4], 128, 64, 4, 4)),
        "d2": _pack_convT_subpixel(*_init_convT(ks[5], 64, 1, 4, 4)),
    }


# ----------------------------------------------------------------------------
# Forward pass (NCHW boundary, NHWC inside).
# ----------------------------------------------------------------------------
def unet_forward(params, x_nchw):
    x = jnp.transpose(x_nchw, (0, 2, 3, 1)).astype(jnp.bfloat16)   # -> NHWC
    # encoder
    x = conv2d(x, params["e1"], 4, 2, 1, 64, "relu")
    x = conv2d(x, params["e2"], 4, 2, 1, 128, "relu")
    # middle
    x = conv2d(x, params["m1"], 3, 1, 1, 128, "relu")
    x = conv2d(x, params["m2"], 3, 1, 1, 128, "relu")
    # decoder (sub-pixel transposed convs)
    x = conv2d(x, params["d1"], 3, 1, 1, 256, "relu")
    x = depth_to_space(x, 64)
    x = conv2d(x, params["d2"], 3, 1, 1, 4, "tanh")
    x = depth_to_space(x, 1)
    return jnp.transpose(x, (0, 3, 1, 2)).astype(jnp.float32)      # -> NCHW


if __name__ == "__main__":
    key = jax.random.PRNGKey(0)
    k_params, k_x = jax.random.split(key)
    params = init_unet_params(k_params)
    x = jax.random.normal(k_x, (2, 1, 16, 16), jnp.float32)        # NCHW like PyTorch

    fwd = jax.jit(unet_forward)
    out = jax.block_until_ready(fwd(params, x))

    assert out.shape == (2, 1, 16, 16), out.shape
    assert bool(jnp.all(jnp.isfinite(out)))
    assert bool(jnp.all(jnp.abs(out) <= 1.0 + 1e-6))               # tanh output range
    print("KERNEL_OK")
</pallas_src>

<mosaic_0001>
module attributes {stable_mosaic.version = 11 : i64} {
  func.func @_fused_matmul_kernel(%arg0: i32, %arg1: memref<128x16xbf16, #tpu.memory_space<vmem>>, %arg2: memref<16x128xbf16, #tpu.memory_space<vmem>>, %arg3: memref<1x128xf32, #tpu.memory_space<vmem>>, %arg4: memref<128x128xbf16, #tpu.memory_space<vmem>>) attributes {dimension_semantics = [#tpu.dimension_semantics<parallel>], iteration_bounds = array<i64: 1>, scalar_prefetch = 0 : i64, scratch_operands = 0 : i64, tpu.core_type = #tpu.core_type<tc>, window_params = [{transform_indices = @transform_0, window_bounds = array<i64: 128, 16>}, {pipeline_mode = #tpu.pipeline_mode<synchronous>, transform_indices = @transform_1, window_bounds = array<i64: 16, 128>}, {pipeline_mode = #tpu.pipeline_mode<synchronous>, transform_indices = @transform_2, window_bounds = array<i64: 1, 128>}, {transform_indices = @transform_3, window_bounds = array<i64: 128, 128>}]} {
    %c0 = arith.constant 0 : index
    %c0_0 = arith.constant 0 : index
    %0 = vector.load %arg1[%c0, %c0_0] : memref<128x16xbf16, #tpu.memory_space<vmem>>, vector<128x16xbf16>
    %c0_1 = arith.constant 0 : index
    %c0_2 = arith.constant 0 : index
    %1 = vector.load %arg2[%c0_1, %c0_2] : memref<16x128xbf16, #tpu.memory_space<vmem>>, vector<16x128xbf16>
    %cst = arith.constant dense<0.000000e+00> : vector<128x128xf32>
    %2 = tpu.matmul %0, %1, %cst {dimension_numbers = #tpu.dot_dimension_numbers<[1], [0], [0], [1], [0, 0, 1, 1], [], []>} : vector<128x16xbf16>, vector<16x128xbf16>, vector<128x128xf32> -> vector<128x128xf32>
    %c0_3 = arith.constant 0 : index
    %c0_4 = arith.constant 0 : index
    %3 = vector.load %arg3[%c0_3, %c0_4] : memref<1x128xf32, #tpu.memory_space<vmem>>, vector<1x128xf32>
    %4 = vector.broadcast %3 : vector<1x128xf32> to vector<128x128xf32>
    %5 = arith.addf %2, %4 : vector<128x128xf32>
    %cst_5 = arith.constant 0.000000e+00 : f32
    %6 = vector.broadcast %cst_5 : f32 to vector<128x128xf32>
    %7 = arith.maximumf %5, %6 : vector<128x128xf32>
    %8 = arith.truncf %7 : vector<128x128xf32> to vector<128x128xbf16>
    %c0_6 = arith.constant 0 : index
    %c0_7 = arith.constant 0 : index
    %9 = vector.load %arg4[%c0_6, %c0_7] : memref<128x128xbf16, #tpu.memory_space<vmem>>, vector<128x128xbf16>
    tpu.vector_store %arg4[%c0_6, %c0_7], %8 {strides = array<i32>} : memref<128x128xbf16, #tpu.memory_space<vmem>>, vector<128x128xbf16>,
    return
  }
  func.func @transform_0(%arg0: i32) -> (i32, i32) {
    %c0_i32 = arith.constant 0 : i32
    %c0_i32_0 = arith.constant 0 : i32
    return %arg0, %c0_i32 : i32, i32
  }
  func.func @transform_1(%arg0: i32) -> (i32, i32) {
    %c0_i32 = arith.constant 0 : i32
    %c0_i32_0 = arith.constant 0 : i32
    %c0_i32_1 = arith.constant 0 : i32
    return %c0_i32, %c0_i32_0 : i32, i32
  }
  func.func @transform_2(%arg0: i32) -> (i32, i32) {
    %c0_i32 = arith.constant 0 : i32
    %c0_i32_0 = arith.constant 0 : i32
    %c0_i32_1 = arith.constant 0 : i32
    return %c0_i32, %c0_i32_0 : i32, i32
  }
  func.func @transform_3(%arg0: i32) -> (i32, i32) {
    %c0_i32 = arith.constant 0 : i32
    %c0_i32_0 = arith.constant 0 : i32
    return %arg0, %c0_i32 : i32, i32
  }
}

module attributes {stable_mosaic.version = 11 : i64} {
  func.func @_fused_matmul_kernel(%arg0: i32, %arg1: memref<32x1024xbf16, #tpu.memory_space<vmem>>, %arg2: memref<1024x128xbf16, #tpu.memory_space<vmem>>, %arg3: memref<1x128xf32, #tpu.memory_space<vmem>>, %arg4: memref<32x128xbf16, #tpu.memory_space<vmem>>) attributes {dimension_semantics = [#tpu.dimension_semantics<parallel>], iteration_bounds = array<i64: 1>, scalar_prefetch = 0 : i64, scratch_operands = 0 : i64, tpu.core_type = #tpu.core_type<tc>, window_params = [{transform_indices = @transform_0, window_bounds = array<i64: 32, 1024>}, {pipeline_mode = #tpu.pipeline_mode<synchronous>, transform_indices = @transform_1, window_bounds = array<i64: 1024, 128>}, {pipeline_mode = #tpu.pipeline_mode<synchronous>, transform_indices = @transform_2, window_bounds = array<i64: 1, 128>}, {transform_indices = @transform_3, window_bounds = array<i64: 32, 128>}]} {
    %c0 = arith.constant 0 : index
    %c0_0 = arith.constant 0 : index
    %0 = vector.load %arg1[%c0, %c0_0] : memref<32x1024xbf16, #tpu.memory_space<vmem>>, vector<32x1024xbf16>
    %c0_1 = arith.constant 0 : index
    %c0_2 = arith.constant 0 : index
    %1 = vector.load %arg2[%c0_1, %c0_2] : memref<1024x128xbf16, #tpu.memory_space<vmem>>, vector<1024x128xbf16>
    %cst = arith.constant dense<0.000000e+00> : vector<32x128xf32>
    %2 = tpu.matmul %0, %1, %cst {dimension_numbers = #tpu.dot_dimension_numbers<[1], [0], [0], [1], [0, 0, 1, 1], [], []>} : vector<32x1024xbf16>, vector<1024x128xbf16>, vector<32x128xf32> -> vector<32x128xf32>
    %c0_3 = arith.constant 0 : index
    %c0_4 = arith.constant 0 : index
    %3 = vector.load %arg3[%c0_3, %c0_4] : memref<1x128xf32, #tpu.memory_space<vmem>>, vector<1x128xf32>
    %4 = vector.broadcast %3 : vector<1x128xf32> to vector<32x128xf32>
    %5 = arith.addf %2, %4 : vector<32x128xf32>
    %cst_5 = arith.constant 0.000000e+00 : f32
    %6 = vector.broadcast %cst_5 : f32 to vector<32x128xf32>
    %7 = arith.maximumf %5, %6 : vector<32x128xf32>
    %8 = arith.truncf %7 : vector<32x128xf32> to vector<32x128xbf16>
    %c0_6 = arith.constant 0 : index
    %c0_7 = arith.constant 0 : index
    %9 = vector.load %arg4[%c0_6, %c0_7] : memref<32x128xbf16, #tpu.memory_space<vmem>>, vector<32x128xbf16>
    tpu.vector_store %arg4[%c0_6, %c0_7], %8 {strides = array<i32>} : memref<32x128xbf16, #tpu.memory_space<vmem>>, vector<32x128xbf16>,
    return
  }
  func.func @transform_0(%arg0: i32) -> (i32, i32) {
    %c0_i32 = arith.constant 0 : i32
    %c0_i32_0 = arith.constant 0 : i32
    return %arg0, %c0_i32 : i32, i32
  }
  func.func @transform_1(%arg0: i32) -> (i32, i32) {
    %c0_i32 = arith.constant 0 : i32
    %c0_i32_0 = arith.constant 0 : i32
    %c0_i32_1 = arith.constant 0 : i32
    return %c0_i32, %c0_i32_0 : i32, i32
  }
  func.func @transform_2(%arg0: i32) -> (i32, i32) {
    %c0_i32 = arith.constant 0 : i32
    %c0_i32_0 = arith.constant 0 : i32
    %c0_i32_1 = arith.constant 0 : i32
    return %c0_i32, %c0_i32_0 : i32, i32
  }
  func.func @transform_3(%arg0: i32) -> (i32, i32) {
    %c0_i32 = arith.constant 0 : i32
    %c0_i32_0 = arith.constant 0 : i32
    return %arg0, %c0_i32 : i32, i32
  }
}

module attributes {stable_mosaic.version = 11 : i64} {
  func.func @_fused_matmul_kernel(%arg0: i32, %arg1: memref<32x1152xbf16, #tpu.memory_space<vmem>>, %arg2: memref<1152x128xbf16, #tpu.memory_space<vmem>>, %arg3: memref<1x128xf32, #tpu.memory_space<vmem>>, %arg4: memref<32x128xbf16, #tpu.memory_space<vmem>>) attributes {dimension_semantics = [#tpu.dimension_semantics<parallel>], iteration_bounds = array<i64: 1>, scalar_prefetch = 0 : i64, scratch_operands = 0 : i64, tpu.core_type = #tpu.core_type<tc>, window_params = [{transform_indices = @transform_0, window_bounds = array<i64: 32, 1152>}, {pipeline_mode = #tpu.pipeline_mode<synchronous>, transform_indices = @transform_1, window_bounds = array<i64: 1152, 128>}, {pipeline_mode = #tpu.pipeline_mode<synchronous>, transform_indices = @transform_2, window_bounds = array<i64: 1, 128>}, {transform_indices = @transform_3, window_bounds = array<i64: 32, 128>}]} {
    %c0 = arith.constant 0 : index
    %c0_0 = arith.constant 0 : index
    %0 = vector.load %arg1[%c0, %c0_0] : memref<32x1152xbf16, #tpu.memory_space<vmem>>, vector<32x1152xbf16>
    %c0_1 = arith.constant 0 : index
    %c0_2 = arith.constant 0 : index
    %1 = vector.load %arg2[%c0_1, %c0_2] : memref<1152x128xbf16, #tpu.memory_space<vmem>>, vector<1152x128xbf16>
    %cst = arith.constant dense<0.000000e+00> : vector<32x128xf32>
    %2 = tpu.matmul %0, %1, %cst {dimension_numbers = #tpu.dot_dimension_numbers<[1], [0], [0], [1], [0, 0, 1, 1], [], []>} : vector<32x1152xbf16>, vector<1152x128xbf16>, vector<32x128xf32> -> vector<32x128xf32>
    %c0_3 = arith.constant 0 : index
    %c0_4 = arith.constant 0 : index
    %3 = vector.load %arg3[%c0_3, %c0_4] : memref<1x128xf32, #tpu.memory_space<vmem>>, vector<1x128xf32>
    %4 = vector.broadcast %3 : vector<1x128xf32> to vector<32x128xf32>
    %5 = arith.addf %2, %4 : vector<32x128xf32>
    %cst_5 = arith.constant 0.000000e+00 : f32
    %6 = vector.broadcast %cst_5 : f32 to vector<32x128xf32>
    %7 = arith.maximumf %5, %6 : vector<32x128xf32>
    %8 = arith.truncf %7 : vector<32x128xf32> to vector<32x128xbf16>
    %c0_6 = arith.constant 0 : index
    %c0_7 = arith.constant 0 : index
    %9 = vector.load %arg4[%c0_6, %c0_7] : memref<32x128xbf16, #tpu.memory_space<vmem>>, vector<32x128xbf16>
    tpu.vector_store %arg4[%c0_6, %c0_7], %8 {strides = array<i32>} : memref<32x128xbf16, #tpu.memory_space<vmem>>, vector<32x128xbf16>,
    return
  }
  func.func @transform_0(%arg0: i32) -> (i32, i32) {
    %c0_i32 = arith.constant 0 : i32
    %c0_i32_0 = arith.constant 0 : i32
    return %arg0, %c0_i32 : i32, i32
  }
  func.func @transform_1(%arg0: i32) -> (i32, i32) {
    %c0_i32 = arith.constant 0 : i32
    %c0_i32_0 = arith.constant 0 : i32
    %c0_i32_1 = arith.constant 0 : i32
    return %c0_i32, %c0_i32_0 : i32, i32
  }
  func.func @transform_2(%arg0: i32) -> (i32, i32) {
    %c0_i32 = arith.constant 0 : i32
    %c0_i32_0 = arith.constant 0 : i32
    %c0_i32_1 = arith.constant 0 : i32
    return %c0_i32, %c0_i32_0 : i32, i32
  }
  func.func @transform_3(%arg0: i32) -> (i32, i32) {
    %c0_i32 = arith.constant 0 : i32
    %c0_i32_0 = arith.constant 0 : i32
    return %arg0, %c0_i32 : i32, i32
  }
}

module attributes {stable_mosaic.version = 11 : i64} {
  func.func @_fused_matmul_kernel(%arg0: i32, %arg1: memref<32x1152xbf16, #tpu.memory_space<vmem>>, %arg2: memref<1152x256xbf16, #tpu.memory_space<vmem>>, %arg3: memref<1x256xf32, #tpu.memory_space<vmem>>, %arg4: memref<32x256xbf16, #tpu.memory_space<vmem>>) attributes {dimension_semantics = [#tpu.dimension_semantics<parallel>], iteration_bounds = array<i64: 1>, scalar_prefetch = 0 : i64, scratch_operands = 0 : i64, tpu.core_type = #tpu.core_type<tc>, window_params = [{transform_indices = @transform_0, window_bounds = array<i64: 32, 1152>}, {pipeline_mode = #tpu.pipeline_mode<synchronous>, transform_indices = @transform_1, window_bounds = array<i64: 1152, 256>}, {pipeline_mode = #tpu.pipeline_mode<synchronous>, transform_indices = @transform_2, window_bounds = array<i64: 1, 256>}, {transform_indices = @transform_3, window_bounds = array<i64: 32, 256>}]} {
    %c0 = arith.constant 0 : index
    %c0_0 = arith.constant 0 : index
    %0 = vector.load %arg1[%c0, %c0_0] : memref<32x1152xbf16, #tpu.memory_space<vmem>>, vector<32x1152xbf16>
    %c0_1 = arith.constant 0 : index
    %c0_2 = arith.constant 0 : index
    %1 = vector.load %arg2[%c0_1, %c0_2] : memref<1152x256xbf16, #tpu.memory_space<vmem>>, vector<1152x256xbf16>
    %cst = arith.constant dense<0.000000e+00> : vector<32x256xf32>
    %2 = tpu.matmul %0, %1, %cst {dimension_numbers = #tpu.dot_dimension_numbers<[1], [0], [0], [1], [0, 0, 1, 1], [], []>} : vector<32x1152xbf16>, vector<1152x256xbf16>, vector<32x256xf32> -> vector<32x256xf32>
    %c0_3 = arith.constant 0 : index
    %c0_4 = arith.constant 0 : index
    %3 = vector.load %arg3[%c0_3, %c0_4] : memref<1x256xf32, #tpu.memory_space<vmem>>, vector<1x256xf32>
    %4 = vector.broadcast %3 : vector<1x256xf32> to vector<32x256xf32>
    %5 = arith.addf %2, %4 : vector<32x256xf32>
    %cst_5 = arith.constant 0.000000e+00 : f32
    %6 = vector.broadcast %cst_5 : f32 to vector<32x256xf32>
    %7 = arith.maximumf %5, %6 : vector<32x256xf32>
    %8 = arith.truncf %7 : vector<32x256xf32> to vector<32x256xbf16>
    %c0_6 = arith.constant 0 : index
    %c0_7 = arith.constant 0 : index
    %9 = vector.load %arg4[%c0_6, %c0_7] : memref<32x256xbf16, #tpu.memory_space<vmem>>, vector<32x256xbf16>
    tpu.vector_store %arg4[%c0_6, %c0_7], %8 {strides = array<i32>} : memref<32x256xbf16, #tpu.memory_space<vmem>>, vector<32x256xbf16>,
    return
  }
  func.func @transform_0(%arg0: i32) -> (i32, i32) {
    %c0_i32 = arith.constant 0 : i32
    %c0_i32_0 = arith.constant 0 : i32
    return %arg0, %c0_i32 : i32, i32
  }
  func.func @transform_1(%arg0: i32) -> (i32, i32) {
    %c0_i32 = arith.constant 0 : i32
    %c0_i32_0 = arith.constant 0 : i32
    %c0_i32_1 = arith.constant 0 : i32
    return %c0_i32, %c0_i32_0 : i32, i32
  }
  func.func @transform_2(%arg0: i32) -> (i32, i32) {
    %c0_i32 = arith.constant 0 : i32
    %c0_i32_0 = arith.constant 0 : i32
    %c0_i32_1 = arith.constant 0 : i32
    return %c0_i32, %c0_i32_0 : i32, i32
  }
  func.func @transform_3(%arg0: i32) -> (i32, i32) {
    %c0_i32 = arith.constant 0 : i32
    %c0_i32_0 = arith.constant 0 : i32
    return %arg0, %c0_i32 : i32, i32
  }
}

module attributes {stable_mosaic.version = 11 : i64} {
  func.func @_fused_matmul_kernel(%arg0: i32, %arg1: memref<128x576xbf16, #tpu.memory_space<vmem>>, %arg2: memref<576x128xbf16, #tpu.memory_space<vmem>>, %arg3: memref<1x128xf32, #tpu.memory_space<vmem>>, %arg4: memref<128x128xbf16, #tpu.memory_space<vmem>>) attributes {dimension_semantics = [#tpu.dimension_semantics<parallel>], iteration_bounds = array<i64: 1>, scalar_prefetch = 0 : i64, scratch_operands = 0 : i64, tpu.core_type = #tpu.core_type<tc>, window_params = [{transform_indices = @transform_0, window_bounds = array<i64: 128, 576>}, {pipeline_mode = #tpu.pipeline_mode<synchronous>, transform_indices = @transform_1, window_bounds = array<i64: 576, 128>}, {pipeline_mode = #tpu.pipeline_mode<synchronous>, transform_indices = @transform_2, window_bounds = array<i64: 1, 128>}, {transform_indices = @transform_3, window_bounds = array<i64: 128, 128>}]} {
    %c0 = arith.constant 0 : index
    %c0_0 = arith.constant 0 : index
    %0 = vector.load %arg1[%c0, %c0_0] : memref<128x576xbf16, #tpu.memory_space<vmem>>, vector<128x576xbf16>
    %c0_1 = arith.constant 0 : index
    %c0_2 = arith.constant 0 : index
    %1 = vector.load %arg2[%c0_1, %c0_2] : memref<576x128xbf16, #tpu.memory_space<vmem>>, vector<576x128xbf16>
    %cst = arith.constant dense<0.000000e+00> : vector<128x128xf32>
    %2 = tpu.matmul %0, %1, %cst {dimension_numbers = #tpu.dot_dimension_numbers<[1], [0], [0], [1], [0, 0, 1, 1], [], []>} : vector<128x576xbf16>, vector<576x128xbf16>, vector<128x128xf32> -> vector<128x128xf32>
    %c0_3 = arith.constant 0 : index
    %c0_4 = arith.constant 0 : index
    %3 = vector.load %arg3[%c0_3, %c0_4] : memref<1x128xf32, #tpu.memory_space<vmem>>, vector<1x128xf32>
    %4 = vector.broadcast %3 : vector<1x128xf32> to vector<128x128xf32>
    %5 = arith.addf %2, %4 : vector<128x128xf32>
    %6 = math.tanh %5 : vector<128x128xf32>
    %7 = arith.truncf %6 : vector<128x128xf32> to vector<128x128xbf16>
    %c0_5 = arith.constant 0 : index
    %c0_6 = arith.constant 0 : index
    %8 = vector.load %arg4[%c0_5, %c0_6] : memref<128x128xbf16, #tpu.memory_space<vmem>>, vector<128x128xbf16>
    tpu.vector_store %arg4[%c0_5, %c0_6], %7 {strides = array<i32>} : memref<128x128xbf16, #tpu.memory_space<vmem>>, vector<128x128xbf16>,
    return
  }
  func.func @transform_0(%arg0: i32) -> (i32, i32) {
    %c0_i32 = arith.constant 0 : i32
    %c0_i32_0 = arith.constant 0 : i32
    return %arg0, %c0_i32 : i32, i32
  }
  func.func @transform_1(%arg0: i32) -> (i32, i32) {
    %c0_i32 = arith.constant 0 : i32
    %c0_i32_0 = arith.constant 0 : i32
    %c0_i32_1 = arith.constant 0 : i32
    return %c0_i32, %c0_i32_0 : i32, i32
  }
  func.func @transform_2(%arg0: i32) -> (i32, i32) {
    %c0_i32 = arith.constant 0 : i32
    %c0_i32_0 = arith.constant 0 : i32
    %c0_i32_1 = arith.constant 0 : i32
    return %c0_i32, %c0_i32_0 : i32, i32
  }
  func.func @transform_3(%arg0: i32) -> (i32, i32) {
    %c0_i32 = arith.constant 0 : i32
    %c0_i32_0 = arith.constant 0 : i32
    return %arg0, %c0_i32 : i32, i32
  }
}

</mosaic_0001>

<bundles_post_ra>
// kernel: unet_forward.6
= control target key start
LH: loop header
LB: loop body
LE: loop exit
PB: predicated region body
PF: predicated region fallthrough
CT: control target
= control target key end

     0   :  { %vm86_vm0 = vcmask 130048   ;;  %s525_s1 = inlined_call_operand.vmem [shape: bf16[16,128], index: 1, kind: input, shape index: {}]   ;;  %s526_s0 = inlined_call_operand.vmem [shape: bf16[128,16], index: 0, kind: input, shape index: {}]   ;;  %s527_s2 = inlined_call_operand.vmem [shape: f32[1,128], index: 2, kind: input, shape index: {}]   ;;  %s528_s3 = inlined_call_operand.vmem [shape: bf16[128,128], index: 3, kind: output, shape index: {}]  }
   0x1   :  { %v434_v0 = vld [vmem:[%s525_s1] sm:$0xff]   ;;  %v437_v3 = vld [vmem:[%s526_s0 + $0x8] sm:$0xff]   ;;  %v439_v5 = vld [vmem:[%s526_s0 + $0x10] sm:$0xff]  }
   0x2   :  { %v435_v1 = vld [vmem:[%s526_s0] sm:$0xff]   ;;  %414 = vmatprep.subr.bf16.mxu0 %v434_v0  ;;  %432 = vmatprep.subr.bf16.mxu1 %v434_v0  ;;  %v438_v4 = vld [vmem:[%s526_s0 + $0x28] sm:$0xff]   ;;  %v440_v6 = vld [vmem:[%s526_s0 + $0x30] sm:$0xff]  }
   0x3   :  { %v436_v2 = vld [vmem:[%s526_s0 + $0x20] sm:$0xff]   ;;  %415 = vmatpush3.bf16.msra.mxu0 %v434_v0  ;;  %433 = vmatpush3.bf16.msra.mxu1 %v434_v0  ;;  %v441_v7 = vld [vmem:[%s526_s0 + $0x18] sm:$0xff]  }
   0x4   :  { %416 = vmatprep.mubr.msk.bf16.mxu0 %vm86_vm0, %v435_v1  ;;  %424 = vmatprep.mubr.msk.bf16.mxu1 %vm86_vm0, %v436_v2  ;;  %v442_v8 = vld [vmem:[%s526_s0 + $0x38] sm:$0xff]   ;;  %v308_v9 = vld [vmem:[%s527_s2] ss:$0 sm:$0xff] }
   0x6   :  { %417 = vmatmul.mubr.msk.bf16.vlgmr.msra.gmra.mrb[0].mxu0 %vm86_vm0, %v437_v3  ;;  %425 = vmatmul.mubr.msk.bf16.vlgmr.msra.gmra.mrb[0].mxu1 %vm86_vm0, %v438_v4 }
   0x7   :  { %420 = vmatprep.mubr.msk.bf16.mxu0 %vm86_vm0, %v439_v5  ;;  %428 = vmatprep.mubr.msk.bf16.mxu1 %vm86_vm0, %v440_v6 }
   0xe   :  { %421 = vmatmul.mubr.msk.bf16.gmra.mrb[4].mxu0 %vm86_vm0, %v441_v7  ;;  %429 = vmatmul.mubr.msk.bf16.gmra.mrb[4].mxu1 %vm86_vm0, %v442_v8 }
  0xd9   :  { %v418_v10 = vpop.f32.mrb[0].mxu0  ;;  %v426_v11 = vpop.f32.mrb[0].mxu1 }
  0xda   :  { %v154_v12 = vadd.f32 %v418_v10, %v308_v9  ;;  %v186_v13 = vadd.f32 %v426_v11, %v308_v9  ;;  %v145_v14 = vpop.f32.mrb[1].mxu0  ;;  %v177_v15 = vpop.f32.mrb[1].mxu1 }
  0xdb   :  { %v146_v16 = vadd.f32 %v308_v9, %v145_v14  ;;  %v178_v17 = vadd.f32 %v308_v9, %v177_v15  ;;  %v419_v18 = vpop.f32.mrb[2].mxu0  ;;  %v427_v19 = vpop.f32.mrb[2].mxu1 }
  0xdc   :  { %v157_v20 = vadd.f32 %v419_v18, %v308_v9  ;;  %v189_v21 = vadd.f32 %v427_v19, %v308_v9  ;;  %v148_v22 = vpop.f32.mrb[3].mxu0  ;;  %v180_v23 = vpop.f32.mrb[3].mxu1  ;;  %v210_v26 = vmax.f32 %v154_v12, 0.0  ;;  %v218_v27 = vmax.f32 %v186_v13, 0.0 }
  0xdd   :  { %v149_v24 = vadd.f32 %v308_v9, %v148_v22  ;;  %v181_v25 = vadd.f32 %v308_v9, %v180_v23  ;;  %v208_v30 = vmax.f32 %v146_v16, 0.0  ;;  %v216_v31 = vmax.f32 %v178_v17, 0.0 }
  0xde   :  { %v211_v28 = vmax.f32 %v157_v20, 0.0  ;;  %v219_v29 = vmax.f32 %v189_v21, 0.0 }
  0xdf   :  { %v209_v32 = vmax.f32 %v149_v24, 0.0  ;;  %v217_v33 = vmax.f32 %v181_v25, 0.0 }
  0xe0   :  { %v366_v34 = vpack.c.bf16 %v211_v28, %v210_v26  ;;  %v386_v35 = vpack.c.bf16 %v219_v29, %v218_v27 }
  0xe1   :  { %v361_v36 = vpack.c.bf16 %v209_v32, %v208_v30  ;;  %v381_v37 = vpack.c.bf16 %v217_v33, %v216_v31  ;;  %v422_v38 = vpop.f32.mrb[4].mxu0  ;;  %v430_v39 = vpop.f32.mrb[4].mxu1 }
  0xe2   :  { %398 = vst [vmem:[%s528_s3 + $0x8] sm:$0xff] %v366_v34   ;;  %402 = vst [vmem:[%s528_s3 + $0x28] sm:$0xff] %v386_v35   ;;  %v170_v40 = vadd.f32 %v422_v38, %v308_v9  ;;  %v202_v41 = vadd.f32 %v430_v39, %v308_v9  ;;  %v161_v42 = vpop.f32.mrb[5].mxu0  ;;  %v193_v43 = vpop.f32.mrb[5].mxu1 }
  0xe3   :  { %362 = vst [vmem:[%s528_s3] sm:$0xff] %v361_v36   ;;  %401 = vst [vmem:[%s528_s3 + $0x20] sm:$0xff] %v381_v37   ;;  %v162_v44 = vadd.f32 %v308_v9, %v161_v42  ;;  %v194_v45 = vadd.f32 %v308_v9, %v193_v43  ;;  %v423_v46 = vpop.f32.mrb[6].mxu0  ;;  %v431_v47 = vpop.f32.mrb[6].mxu1 }
  0xe4   :  { %v173_v48 = vadd.f32 %v423_v46, %v308_v9  ;;  %v205_v49 = vadd.f32 %v431_v47, %v308_v9  ;;  %v164_v50 = vpop.f32.mrb[7].mxu0  ;;  %v196_v51 = vpop.f32.mrb[7].mxu1  ;;  %v214_v54 = vmax.f32 %v170_v40, 0.0  ;;  %v222_v55 = vmax.f32 %v202_v41, 0.0 }
  0xe5   :  { %v165_v52 = vadd.f32 %v308_v9, %v164_v50  ;;  %v197_v53 = vadd.f32 %v308_v9, %v196_v51  ;;  %v212_v58 = vmax.f32 %v162_v44, 0.0  ;;  %v220_v59 = vmax.f32 %v194_v45, 0.0 }
  0xe6   :  { %v215_v56 = vmax.f32 %v173_v48, 0.0  ;;  %v223_v57 = vmax.f32 %v205_v49, 0.0 }
  0xe7   :  { %v213_v60 = vmax.f32 %v165_v52, 0.0  ;;  %v221_v61 = vmax.f32 %v197_v53, 0.0 }
  0xe8   :  { %v376_v62 = vpack.c.bf16 %v215_v56, %v214_v54  ;;  %v396_v63 = vpack.c.bf16 %v223_v57, %v222_v55 }
  0xe9   :  { %v371_v0 = vpack.c.bf16 %v213_v60, %v212_v58  ;;  %v391_v1 = vpack.c.bf16 %v221_v61, %v220_v59 }
  0xea   :  { %400 = vst [vmem:[%s528_s3 + $0x18] sm:$0xff] %v376_v62   ;;  %404 = vst [vmem:[%s528_s3 + $0x38] sm:$0xff] %v396_v63  }
  0xeb   :  { %399 = vst [vmem:[%s528_s3 + $0x10] sm:$0xff] %v371_v0   ;;  %403 = vst [vmem:[%s528_s3 + $0x30] sm:$0xff] %v391_v1  }

// kernel: unet_forward.7
= control target key start
LH: loop header
LB: loop body
LE: loop exit
PB: predicated region body
PF: predicated region fallthrough
CT: control target
= control target key end

     0   :  { %s1399_s1 = inlined_call_operand.vmem [shape: bf16[1024,128], index: 1, kind: input, shape index: {}]   ;;  %s1400_s0 = inlined_call_operand.vmem [shape: bf16[32,1024], index: 0, kind: input, shape index: {}]   ;;  %s1401_s2 = inlined_call_operand.vmem [shape: f32[1,128], index: 2, kind: input, shape index: {}]   ;;  %s1402_s3 = inlined_call_operand.vmem [shape: bf16[32,128], index: 3, kind: output, shape index: {}]  }
   0x1   :  { %v1066_v0 = vld [vmem:[%s1399_s1 + $0x40] sm:$0xff]   ;;  %v1070_v4 = vld [vmem:[%s1399_s1 + $0x48] sm:$0xff]   ;;  %v1074_v8 = vld [vmem:[%s1399_s1 + $0x50] sm:$0xff]  }
   0x2   :  { %v1067_v1 = vld [vmem:[%s1399_s1 + $0xc0] sm:$0xff]   ;;  %954 = vmatprep.subr.bf16.mxu0 %v1066_v0  ;;  %v1071_v5 = vld [vmem:[%s1399_s1 + $0xc8] sm:$0xff]   ;;  %v1075_v9 = vld [vmem:[%s1399_s1 + $0xd0] sm:$0xff]  }
   0x3   :  { %v1068_v2 = vld [vmem:[%s1399_s1] sm:$0xff]   ;;  %982 = vmatprep.subr.bf16.mxu1 %v1067_v1  ;;  %v1072_v6 = vld [vmem:[%s1399_s1 + $0x8] sm:$0xff]   ;;  %v1076_v10 = vld [vmem:[%s1399_s1 + $0x10] sm:$0xff]  }
   0x4   :  { %v1069_v3 = vld [vmem:[%s1399_s1 + $0x80] sm:$0xff]   ;;  %955 = vmatpush3.bf16.msra.mxu0 %v1068_v2  ;;  %v1073_v7 = vld [vmem:[%s1399_s1 + $0x88] sm:$0xff]   ;;  %v1077_v11 = vld [vmem:[%s1399_s1 + $0x90] sm:$0xff]  }
   0x5   :  { %983 = vmatpush3.bf16.msra.mxu1 %v1069_v3  ;;  %956 = vmatprep.subr.bf16.mxu0 %v1070_v4  ;;  %v1078_v12 = vld [vmem:[%s1399_s1 + $0x58] sm:$0xff]   ;;  %v1082_v16 = vld [vmem:[%s1399_s1 + $0x60] sm:$0xff]   ;;  %v1086_v20 = vld [vmem:[%s1399_s1 + $0x68] sm:$0xff]  }
   0x6   :  { %984 = vmatprep.subr.bf16.mxu1 %v1071_v5  ;;  %v1079_v13 = vld [vmem:[%s1399_s1 + $0xd8] sm:$0xff]   ;;  %v1083_v17 = vld [vmem:[%s1399_s1 + $0xe0] sm:$0xff]   ;;  %v1087_v21 = vld [vmem:[%s1399_s1 + $0xe8] sm:$0xff]  }
   0x7   :  { %v1080_v14 = vld [vmem:[%s1399_s1 + $0x18] sm:$0xff]   ;;  %v1084_v18 = vld [vmem:[%s1399_s1 + $0x20] sm:$0xff]   ;;  %v1088_v22 = vld [vmem:[%s1399_s1 + $0x28] sm:$0xff]  }
   0x8   :  { %957 = vmatpush3.bf16.msra.mxu0 %v1072_v6  ;;  %v1081_v15 = vld [vmem:[%s1399_s1 + $0x98] sm:$0xff]   ;;  %v1085_v19 = vld [vmem:[%s1399_s1 + $0xa0] sm:$0xff]   ;;  %v1089_v23 = vld [vmem:[%s1399_s1 + $0xa8] sm:$0xff]  }
   0x9   :  { %985 = vmatpush3.bf16.msra.mxu1 %v1073_v7  ;;  %958 = vmatprep.subr.bf16.mxu0 %v1074_v8  ;;  %v1090_v24 = vld [vmem:[%s1399_s1 + $0x70] sm:$0xff]   ;;  %v1094_v28 = vld [vmem:[%s1399_s1 + $0x78] sm:$0xff]   ;;  %v15_v32 = vld [vmem:[%s1400_s0] sm:$0xff] }
   0xa   :  { %986 = vmatprep.subr.bf16.mxu1 %v1075_v9  ;;  %v1091_v25 = vld [vmem:[%s1399_s1 + $0xf0] sm:$0xff]   ;;  %v1095_v29 = vld [vmem:[%s1399_s1 + $0xf8] sm:$0xff]   ;;  %v19_v33 = vld [vmem:[%s1400_s0 + $0x20] sm:$0xff] }
   0xb   :  { %v1092_v26 = vld [vmem:[%s1399_s1 + $0x30] sm:$0xff]   ;;  %v1096_v30 = vld [vmem:[%s1399_s1 + $0x38] sm:$0xff]   ;;  %v16_v34 = vld [vmem:[%s1400_s0 + $0x8] sm:$0xff]  ;;  %v855_v35 = vcombine.low %v15_v32, %v19_v33  ;;  %v856_v36 = vcombine.high %v15_v32, %v19_v33 }
   0xc   :  { %959 = vmatpush3.bf16.msra.mxu0 %v1076_v10  ;;  %v1093_v27 = vld [vmem:[%s1399_s1 + $0xb0] sm:$0xff]   ;;  %v1097_v31 = vld [vmem:[%s1399_s1 + $0xb8] sm:$0xff]   ;;  %v20_v37 = vld [vmem:[%s1400_s0 + $0x28] sm:$0xff] }
   0xd   :  { %987 = vmatpush3.bf16.msra.mxu1 %v1077_v11  ;;  %960 = vmatprep.subr.bf16.mxu0 %v1078_v12  ;;  %v857_v38 = vcombine.low %v16_v34, %v20_v37  ;;  %v858_v39 = vcombine.high %v16_v34, %v20_v37  ;;  %v1098_v40 = vld [vmem:[%s1399_s1 + $0x140] sm:$0xff]   ;;  %v1102_v44 = vld [vmem:[%s1399_s1 + $0x148] sm:$0xff]   ;;  %v1106_v48 = vld [vmem:[%s1399_s1 + $0x150] sm:$0xff]  }
   0xe   :  { %988 = vmatprep.subr.bf16.mxu1 %v1079_v13  ;;  %662 = vmatprep.mubr.bf16.mxu0 %v856_v36  ;;  %v1099_v41 = vld [vmem:[%s1399_s1 + $0x1c0] sm:$0xff]   ;;  %v1103_v45 = vld [vmem:[%s1399_s1 + $0x1c8] sm:$0xff]   ;;  %v1107_v49 = vld [vmem:[%s1399_s1 + $0x1d0] sm:$0xff]  }
   0xf   :  { %711 = vmatprep.mubr.bf16.mxu1 %v858_v39  ;;  %v1100_v42 = vld [vmem:[%s1399_s1 + $0x100] sm:$0xff]   ;;  %v1104_v46 = vld [vmem:[%s1399_s1 + $0x108] sm:$0xff]   ;;  %v1108_v50 = vld [vmem:[%s1399_s1 + $0x110] sm:$0xff]  }
  0x10   :  { %961 = vmatpush3.bf16.msra.mxu0 %v1080_v14  ;;  %v1101_v43 = vld [vmem:[%s1399_s1 + $0x180] sm:$0xff]   ;;  %v1105_v47 = vld [vmem:[%s1399_s1 + $0x188] sm:$0xff]   ;;  %v1109_v51 = vld [vmem:[%s1399_s1 + $0x190] sm:$0xff]  }
  0x11   :  { %989 = vmatpush3.bf16.msra.mxu1 %v1081_v15  ;;  %962 = vmatprep.subr.bf16.mxu0 %v1082_v16  ;;  %v1110_v52 = vld [vmem:[%s1399_s1 + $0x158] sm:$0xff]   ;;  %v1114_v56 = vld [vmem:[%s1399_s1 + $0x160] sm:$0xff]   ;;  %v1118_v63 = vld [vmem:[%s1399_s1 + $0x168] sm:$0xff]  }
  0x12   :  { %990 = vmatprep.subr.bf16.mxu1 %v1083_v17  ;;  %v1111_v53 = vld [vmem:[%s1399_s1 + $0x1d8] sm:$0xff]   ;;  %v1115_v57 = vld [vmem:[%s1399_s1 + $0x1e0] sm:$0xff]   ;;  %v1119_v1 = vld [vmem:[%s1399_s1 + $0x1e8] sm:$0xff]  }
  0x13   :  { %v1112_v54 = vld [vmem:[%s1399_s1 + $0x118] sm:$0xff]   ;;  %v1116_v58 = vld [vmem:[%s1399_s1 + $0x120] sm:$0xff]   ;;  %v1120_v2 = vld [vmem:[%s1399_s1 + $0x128] sm:$0xff]  }
  0x14   :  { %963 = vmatpush3.bf16.msra.mxu0 %v1084_v18  ;;  %v1113_v55 = vld [vmem:[%s1399_s1 + $0x198] sm:$0xff]   ;;  %v1117_v59 = vld [vmem:[%s1399_s1 + $0x1a0] sm:$0xff]   ;;  %v1121_v3 = vld [vmem:[%s1399_s1 + $0x1a8] sm:$0xff]  }
  0x15   :  { %991 = vmatpush3.bf16.msra.mxu1 %v1085_v19  ;;  %964 = vmatprep.subr.bf16.mxu0 %v1086_v20  ;;  %v23_v60 = vld [vmem:[%s1400_s0 + $0x40] sm:$0xff]  ;;  %v24_v4 = vld [vmem:[%s1400_s0 + $0x48] sm:$0xff]  ;;  %v1122_v8 = vld [vmem:[%s1399_s1 + $0x170] sm:$0xff]  }
  0x16   :  { %992 = vmatprep.subr.bf16.mxu1 %v1087_v21  ;;  %v27_v61 = vld [vmem:[%s1400_s0 + $0x60] sm:$0xff]  ;;  %v28_v5 = vld [vmem:[%s1400_s0 + $0x68] sm:$0xff]  ;;  %v1123_v9 = vld [vmem:[%s1399_s1 + $0x1f0] sm:$0xff]  }
  0x17   :  { %v864_v62 = vcombine.high %v23_v60, %v27_v61  ;;  %v863_v0 = vcombine.low %v23_v60, %v27_v61  ;;  %v866_v6 = vcombine.high %v24_v4, %v28_v5  ;;  %v865_v7 = vcombine.low %v24_v4, %v28_v5  ;;  %v1124_v10 = vld [vmem:[%s1399_s1 + $0x130] sm:$0xff]   ;;  %v1126_v12 = vld [vmem:[%s1399_s1 + $0x178] sm:$0xff]   ;;  %v854_v34 = vld [vmem:[%s1401_s2] ss:$0 sm:$0xff] }
  0x18   :  { %965 = vmatpush3.bf16.msra.mxu0 %v1088_v22  ;;  %v1125_v11 = vld [vmem:[%s1399_s1 + $0x1b0] sm:$0xff]   ;;  %v1127_v13 = vld [vmem:[%s1399_s1 + $0x1f8] sm:$0xff]  }
  0x19   :  { %993 = vmatpush3.bf16.msra.mxu1 %v1089_v23  ;;  %966 = vmatprep.subr.bf16.mxu0 %v1090_v24  ;;  %v1128_v14 = vld [vmem:[%s1399_s1 + $0x138] sm:$0xff]   ;;  %v17_v16 = vld [vmem:[%s1400_s0 + $0x10] sm:$0xff] }
  0x1a   :  { %994 = vmatprep.subr.bf16.mxu1 %v1091_v25  ;;  %v1129_v15 = vld [vmem:[%s1399_s1 + $0x1b8] sm:$0xff]   ;;  %v21_v17 = vld [vmem:[%s1400_s0 + $0x30] sm:$0xff] }
  0x1b   :  { %v18_v18 = vld [vmem:[%s1400_s0 + $0x18] sm:$0xff]  ;;  %v859_v20 = vcombine.low %v17_v16, %v21_v17  ;;  %v860_v21 = vcombine.high %v17_v16, %v21_v17  ;;  %v25_v24 = vld [vmem:[%s1400_s0 + $0x50] sm:$0xff] }
  0x1c   :  { %967 = vmatpush3.bf16.msra.mxu0 %v1092_v26  ;;  %v22_v19 = vld [vmem:[%s1400_s0 + $0x38] sm:$0xff]  ;;  %v29_v25 = vld [vmem:[%s1400_s0 + $0x70] sm:$0xff] }
  0x1d   :  { %995 = vmatpush3.bf16.msra.mxu1 %v1093_v27  ;;  %968 = vmatprep.subr.bf16.mxu0 %v1094_v28  ;;  %v861_v22 = vcombine.low %v18_v18, %v22_v19  ;;  %v862_v23 = vcombine.high %v18_v18, %v22_v19  ;;  %v26_v26 = vld [vmem:[%s1400_s0 + $0x58] sm:$0xff]  ;;  %v868_v27 = vcombine.high %v25_v24, %v29_v25 }
  0x1e   :  { %996 = vmatprep.subr.bf16.mxu1 %v1095_v29  ;;  %v30_v28 = vld [vmem:[%s1400_s0 + $0x78] sm:$0xff] }
  0x1f   :  { %v870_v29 = vcombine.high %v26_v26, %v30_v28 }
  0x20   :  { %969 = vmatpush3.bf16.msra.mxu0 %v1096_v30  ;;  %v867_v30 = vcombine.low %v25_v24, %v29_v25 }
  0x21   :  { %997 = vmatpush3.bf16.msra.mxu1 %v1097_v31  ;;  %1010 = vmatprep.subr.bf16.mxu0 %v1098_v40  ;;  %v869_v31 = vcombine.low %v26_v26, %v30_v28 }
  0x22   :  { %1038 = vmatprep.subr.bf16.mxu1 %v1099_v41 }
  0x23   :  { %663 = vmatmul.mubr.bf16.vlgmr.msra.gmra.mrb[0].mxu0 %v855_v35 }
  0x24   :  { %712 = vmatmul.mubr.bf16.vlgmr.msra.gmra.mrb[0].mxu1 %v857_v38  ;;  %1011 = vmatpush3.bf16.msra.mxu0 %v1100_v42 }
  0x25   :  { %1039 = vmatpush3.bf16.msra.mxu1 %v1101_v43  ;;  %1012 = vmatprep.subr.bf16.mxu0 %v1102_v44 }
  0x26   :  { %1040 = vmatprep.subr.bf16.mxu1 %v1103_v45  ;;  %670 = vmatprep.mubr.bf16.mxu0 %v864_v62 }
  0x27   :  { %719 = vmatprep.mubr.bf16.mxu1 %v866_v6 }
  0x28   :  { %1013 = vmatpush3.bf16.msra.mxu0 %v1104_v46 }
  0x29   :  { %1041 = vmatpush3.bf16.msra.mxu1 %v1105_v47  ;;  %1014 = vmatprep.subr.bf16.mxu0 %v1106_v48 }
  0x2a   :  { %1042 = vmatprep.subr.bf16.mxu1 %v1107_v49 }
  0x2b   :  { %671 = vmatmul.mubr.bf16.gmra.mrb[4].mxu0 %v863_v0 }
  0x2c   :  { %1015 = vmatpush3.bf16.msra.mxu0 %v1108_v50  ;;  %720 = vmatmul.mubr.bf16.gmra.mrb[4].mxu1 %v865_v7 }
  0x2d   :  { %1043 = vmatpush3.bf16.msra.mxu1 %v1109_v51  ;;  %1016 = vmatprep.subr.bf16.mxu0 %v1110_v52 }
  0x2e   :  { %1044 = vmatprep.subr.bf16.mxu1 %v1111_v53  ;;  %760 = vmatprep.mubr.bf16.mxu0 %v860_v21 }
  0x2f   :  { %809 = vmatprep.mubr.bf16.mxu1 %v862_v23 }
  0x30   :  { %1017 = vmatpush3.bf16.msra.mxu0 %v1112_v54 }
  0x31   :  { %1045 = vmatpush3.bf16.msra.mxu1 %v1113_v55  ;;  %1018 = vmatprep.subr.bf16.mxu0 %v1114_v56 }
  0x32   :  { %1046 = vmatprep.subr.bf16.mxu1 %v1115_v57 }
  0x34   :  { %1019 = vmatpush3.bf16.msra.mxu0 %v1116_v58 }
  0x35   :  { %1047 = vmatpush3.bf16.msra.mxu1 %v1117_v59  ;;  %1020 = vmatprep.subr.bf16.mxu0 %v1118_v63 }
  0x36   :  { %1048 = vmatprep.subr.bf16.mxu1 %v1119_v1 }
  0x38   :  { %1021 = vmatpush3.bf16.msra.mxu0 %v1120_v2 }
  0x39   :  { %1049 = vmatpush3.bf16.msra.mxu1 %v1121_v3  ;;  %1022 = vmatprep.subr.bf16.mxu0 %v1122_v8 }
  0x3a   :  { %1050 = vmatprep.subr.bf16.mxu1 %v1123_v9 }
  0x3c   :  { %1023 = vmatpush3.bf16.msra.mxu0 %v1124_v10 }
  0x3d   :  { %1051 = vmatpush3.bf16.msra.mxu1 %v1125_v11  ;;  %1024 = vmatprep.subr.bf16.mxu0 %v1126_v12 }
  0x3e   :  { %1052 = vmatprep.subr.bf16.mxu1 %v1127_v13 }
  0x40   :  { %1025 = vmatpush3.bf16.msra.mxu0 %v1128_v14 }
  0x41   :  { %1053 = vmatpush3.bf16.msra.mxu1 %v1129_v15 }
  0x43   :  { %761 = vmatmul.mubr.bf16.vlgmr.msra.gmra.mrb[8].mxu0 %v859_v20 }
  0x44   :  { %810 = vmatmul.mubr.bf16.vlgmr.msra.gmra.mrb[8].mxu1 %v861_v22  ;;  %768 = vmatprep.mubr.bf16.mxu0 %v868_v27 }
  0x45   :  { %817 = vmatprep.mubr.bf16.mxu1 %v870_v29 }
  0x4b   :  { %769 = vmatmul.mubr.bf16.gmra.mrb[12].mxu0 %v867_v30 }
  0x4c   :  { %818 = vmatmul.mubr.bf16.gmra.mrb[12].mxu1 %v869_v31 }
  0xf6   :  { %v970_v32 = vpop.f32.mrb[0].mxu0 }
  0xf7   :  { %v998_v33 = vpop.f32.mrb[0].mxu1  ;;  %v971_v35 = vpop.f32.mrb[1].mxu0 }
  0xf8   :  { %v972_v36 = vadd.f32 %v971_v35, %v970_v32  ;;  %v999_v37 = vpop.f32.mrb[1].mxu1  ;;  %v973_v38 = vpop.f32.mrb[2].mxu0 }
  0xf9   :  { %v1000_v39 = vadd.f32 %v999_v37, %v998_v33  ;;  %v1001_v40 = vpop.f32.mrb[2].mxu1  ;;  %v974_v41 = vpop.f32.mrb[3].mxu0 }
  0xfa   :  { %v665_v42 = vadd.f32 %v972_v36, %v854_v34  ;;  %v975_v43 = vadd.f32 %v974_v41, %v973_v38  ;;  %v1002_v44 = vpop.f32.mrb[3].mxu1 }
  0xfb   :  { %v1003_v45 = vadd.f32 %v1002_v44, %v1001_v40 }
  0xfc   :  { %v714_v46 = vadd.f32 %v1000_v39, %v665_v42  ;;  %v668_v47 = vadd.f32 %v975_v43, %v854_v34 }
  0xfe   :  { %v717_v48 = vadd.f32 %v1003_v45, %v668_v47  ;;  %v976_v49 = vpop.f32.mrb[4].mxu0 }
  0xff   :  { %v977_v50 = vpop.f32.mrb[5].mxu0  ;;  %v1004_v56 = vpop.f32.mrb[4].mxu1 }
 0x100   :  { %v978_v51 = vadd.f32 %v977_v50, %v976_v49  ;;  %v979_v52 = vpop.f32.mrb[6].mxu0  ;;  %v1005_v57 = vpop.f32.mrb[5].mxu1 }
 0x101   :  { %v980_v53 = vpop.f32.mrb[7].mxu0  ;;  %v1006_v59 = vadd.f32 %v1005_v57, %v1004_v56  ;;  %v1007_v60 = vpop.f32.mrb[6].mxu1 }
 0x102   :  { %v981_v54 = vadd.f32 %v980_v53, %v979_v52  ;;  %v673_v55 = vadd.f32 %v978_v51, %v854_v34  ;;  %v1008_v61 = vpop.f32.mrb[7].mxu1 }
 0x103   :  { %v1009_v63 = vadd.f32 %v1008_v61, %v1007_v60 }
 0x104   :  { %v676_v58 = vadd.f32 %v981_v54, %v854_v34  ;;  %v722_v62 = vadd.f32 %v1006_v59, %v673_v55 }
 0x106   :  { %v725_v0 = vadd.f32 %v1009_v63, %v676_v58 }
 0x116   :  { %v1026_v1 = vpop.f32.mrb[8].mxu0 }
 0x117   :  { %v1054_v2 = vpop.f32.mrb[8].mxu1  ;;  %v1027_v3 = vpop.f32.mrb[9].mxu0 }
 0x118   :  { %v1055_v4 = vpop.f32.mrb[9].mxu1  ;;  %v1028_v5 = vadd.f32 %v1027_v3, %v1026_v1  ;;  %v1029_v7 = vpop.f32.mrb[10].mxu0 }
 0x119   :  { %v1056_v6 = vadd.f32 %v1055_v4, %v1054_v2  ;;  %v1057_v8 = vpop.f32.mrb[10].mxu1  ;;  %v1030_v9 = vpop.f32.mrb[11].mxu0 }
 0x11a   :  { %v1058_v10 = vpop.f32.mrb[11].mxu1  ;;  %v763_v11 = vadd.f32 %v1028_v5, %v714_v46  ;;  %v1031_v12 = vadd.f32 %v1030_v9, %v1029_v7 }
 0x11b   :  { %v1059_v13 = vadd.f32 %v1058_v10, %v1057_v8 }
 0x11c   :  { %v812_v14 = vadd.f32 %v1056_v6, %v763_v11  ;;  %v766_v15 = vadd.f32 %v1031_v12, %v717_v48 }
 0x11e   :  { %v815_v16 = vadd.f32 %v1059_v13, %v766_v15  ;;  %v1032_v17 = vpop.f32.mrb[12].mxu0  ;;  %v826_v21 = vmax.f32 %v812_v14, 0.0 }
 0x11f   :  { %v1060_v18 = vpop.f32.mrb[12].mxu1  ;;  %v1033_v19 = vpop.f32.mrb[13].mxu0 }
 0x120   :  { %v1061_v20 = vpop.f32.mrb[13].mxu1  ;;  %v827_v22 = vmax.f32 %v815_v16, 0.0  ;;  %v1034_v23 = vadd.f32 %v1033_v19, %v1032_v17  ;;  %v1035_v25 = vpop.f32.mrb[14].mxu0 }
 0x121   :  { %v1062_v24 = vadd.f32 %v1061_v20, %v1060_v18  ;;  %v1063_v26 = vpop.f32.mrb[14].mxu1  ;;  %v1036_v27 = vpop.f32.mrb[15].mxu0 }
 0x122   :  { %v1064_v28 = vpop.f32.mrb[15].mxu1  ;;  %v946_v29 = vpack.c.bf16 %v827_v22, %v826_v21  ;;  %v771_v30 = vadd.f32 %v1034_v23, %v722_v62  ;;  %v1037_v31 = vadd.f32 %v1036_v27, %v1035_v25 }
 0x123   :  { %v1065_v32 = vadd.f32 %v1064_v28, %v1063_v26 }
 0x124   :  { %947 = vst [vmem:[%s1402_s3] sm:$0xff] %v946_v29   ;;  %v820_v33 = vadd.f32 %v1062_v24, %v771_v30  ;;  %v774_v34 = vadd.f32 %v1037_v31, %v725_v0 }
 0x126   :  { %v823_v35 = vadd.f32 %v1065_v32, %v774_v34  ;;  %v828_v36 = vmax.f32 %v820_v33, 0.0 }
 0x128   :  { %v829_v37 = vmax.f32 %v823_v35, 0.0 }
 0x12a   :  { %v951_v38 = vpack.c.bf16 %v829_v37, %v828_v36 }
 0x12c   :  { %953 = vst [vmem:[%s1402_s3 + $0x8] sm:$0xff] %v951_v38  }

// kernel: unet_forward.8
= control target key start
LH: loop header
LB: loop body
LE: loop exit
PB: predicated region body
PF: predicated region fallthrough
CT: control target
= control target key end

     0   :  { %s1632_s1 = inlined_call_operand.vmem [shape: bf16[1152,128], index: 1, kind: input, shape index: {}]   ;;  %s1633_s0 = inlined_call_operand.vmem [shape: bf16[32,1152], index: 0, kind: input, shape index: {}]   ;;  %s1634_s2 = inlined_call_operand.vmem [shape: f32[1,128], index: 2, kind: input, shape index: {}]   ;;  %s1635_s3 = inlined_call_operand.vmem [shape: bf16[32,128], index: 3, kind: output, shape index: {}]  }
   0x1   :  { %v1235_v0 = vld [vmem:[%s1632_s1 + $0x40] sm:$0xff]   ;;  %v1239_v4 = vld [vmem:[%s1632_s1 + $0x48] sm:$0xff]   ;;  %v1243_v8 = vld [vmem:[%s1632_s1 + $0x50] sm:$0xff]  }
   0x2   :  { %v1236_v1 = vld [vmem:[%s1632_s1] sm:$0xff]   ;;  %1093 = vmatprep.subr.bf16.mxu0 %v1235_v0  ;;  %v1240_v5 = vld [vmem:[%s1632_s1 + $0x8] sm:$0xff]   ;;  %v1244_v9 = vld [vmem:[%s1632_s1 + $0x10] sm:$0xff]  }
   0x3   :  { %v1237_v2 = vld [vmem:[%s1632_s1 + $0xc0] sm:$0xff]   ;;  %1094 = vmatpush3.bf16.msra.mxu0 %v1236_v1  ;;  %v1241_v6 = vld [vmem:[%s1632_s1 + $0xc8] sm:$0xff]   ;;  %v1245_v10 = vld [vmem:[%s1632_s1 + $0xd0] sm:$0xff]  }
   0x4   :  { %v1238_v3 = vld [vmem:[%s1632_s1 + $0x80] sm:$0xff]   ;;  %1121 = vmatprep.subr.bf16.mxu1 %v1237_v2  ;;  %1095 = vmatprep.subr.bf16.mxu0 %v1239_v4  ;;  %v1242_v7 = vld [vmem:[%s1632_s1 + $0x88] sm:$0xff]   ;;  %v1246_v11 = vld [vmem:[%s1632_s1 + $0x90] sm:$0xff]  }
   0x5   :  { %1122 = vmatpush3.bf16.msra.mxu1 %v1238_v3  ;;  %v1247_v12 = vld [vmem:[%s1632_s1 + $0x58] sm:$0xff]   ;;  %v1251_v16 = vld [vmem:[%s1632_s1 + $0x60] sm:$0xff]   ;;  %v1255_v20 = vld [vmem:[%s1632_s1 + $0x68] sm:$0xff]  }
   0x6   :  { %1123 = vmatprep.subr.bf16.mxu1 %v1241_v6  ;;  %v1248_v13 = vld [vmem:[%s1632_s1 + $0x18] sm:$0xff]   ;;  %v1252_v17 = vld [vmem:[%s1632_s1 + $0x20] sm:$0xff]   ;;  %v1256_v21 = vld [vmem:[%s1632_s1 + $0x28] sm:$0xff]  }
   0x7   :  { %1096 = vmatpush3.bf16.msra.mxu0 %v1240_v5  ;;  %v1249_v14 = vld [vmem:[%s1632_s1 + $0xd8] sm:$0xff]   ;;  %v1253_v18 = vld [vmem:[%s1632_s1 + $0xe0] sm:$0xff]   ;;  %v1257_v22 = vld [vmem:[%s1632_s1 + $0xe8] sm:$0xff]  }
   0x8   :  { %1097 = vmatprep.subr.bf16.mxu0 %v1243_v8  ;;  %v1250_v15 = vld [vmem:[%s1632_s1 + $0x98] sm:$0xff]   ;;  %v1254_v19 = vld [vmem:[%s1632_s1 + $0xa0] sm:$0xff]   ;;  %v1258_v23 = vld [vmem:[%s1632_s1 + $0xa8] sm:$0xff]  }
   0x9   :  { %1124 = vmatpush3.bf16.msra.mxu1 %v1242_v7  ;;  %v1259_v24 = vld [vmem:[%s1632_s1 + $0x70] sm:$0xff]   ;;  %v1263_v28 = vld [vmem:[%s1632_s1 + $0x78] sm:$0xff]   ;;  %v1266_v31 = vld [vmem:[%s1633_s0] ss:$36 sps:$4 sm:$0xff]  }
   0xa   :  { %1125 = vmatprep.subr.bf16.mxu1 %v1245_v10  ;;  %v1260_v25 = vld [vmem:[%s1632_s1 + $0x30] sm:$0xff]   ;;  %v1264_v29 = vld [vmem:[%s1632_s1 + $0x38] sm:$0xff]   ;;  %v1268_v32 = vld [vmem:[%s1633_s0 + $0x4] ss:$36 sps:$4 sm:$0xff]  }
   0xb   :  { %1098 = vmatpush3.bf16.msra.mxu0 %v1244_v9  ;;  %v1261_v26 = vld [vmem:[%s1632_s1 + $0xf0] sm:$0xff]   ;;  %v1265_v30 = vld [vmem:[%s1632_s1 + $0xf8] sm:$0xff]   ;;  %742 = vmatprep.mubr.bf16.mxu0 %v1268_v32  ;;  %v1270_v34 = vld [vmem:[%s1632_s1 + $0x140] sm:$0xff]  }
   0xc   :  { %1099 = vmatprep.subr.bf16.mxu0 %v1247_v12  ;;  %v1262_v27 = vld [vmem:[%s1632_s1 + $0xb0] sm:$0xff]   ;;  %v1269_v33 = vld [vmem:[%s1632_s1 + $0xb8] sm:$0xff]   ;;  %v1271_v35 = vld [vmem:[%s1633_s0 + $0x8] ss:$36 sps:$4 sm:$0xff]  }
   0xd   :  { %1126 = vmatpush3.bf16.msra.mxu1 %v1246_v11  ;;  %v1273_v36 = vld [vmem:[%s1633_s0 + $0xc] ss:$36 sps:$4 sm:$0xff]   ;;  %v1274_v37 = vld [vmem:[%s1632_s1 + $0x100] sm:$0xff]   ;;  %v1285_v48 = vld [vmem:[%s1632_s1 + $0x158] sm:$0xff]  }
   0xe   :  { %1127 = vmatprep.subr.bf16.mxu1 %v1249_v14  ;;  %791 = vmatprep.mubr.bf16.mxu1 %v1273_v36  ;;  %v1275_v38 = vld [vmem:[%s1632_s1 + $0x1c0] sm:$0xff]   ;;  %v1277_v40 = vld [vmem:[%s1632_s1 + $0x148] sm:$0xff]   ;;  %v1281_v44 = vld [vmem:[%s1632_s1 + $0x150] sm:$0xff]  }
   0xf   :  { %1100 = vmatpush3.bf16.msra.mxu0 %v1248_v13  ;;  %v1276_v39 = vld [vmem:[%s1632_s1 + $0x180] sm:$0xff]   ;;  %v1278_v41 = vld [vmem:[%s1632_s1 + $0x108] sm:$0xff]   ;;  %v1282_v45 = vld [vmem:[%s1632_s1 + $0x110] sm:$0xff]  }
  0x10   :  { %1101 = vmatprep.subr.bf16.mxu0 %v1251_v16  ;;  %v1279_v42 = vld [vmem:[%s1632_s1 + $0x1c8] sm:$0xff]   ;;  %v1283_v46 = vld [vmem:[%s1632_s1 + $0x1d0] sm:$0xff]   ;;  %v1286_v49 = vld [vmem:[%s1632_s1 + $0x118] sm:$0xff]  }
  0x11   :  { %1128 = vmatpush3.bf16.msra.mxu1 %v1250_v15  ;;  %v1280_v43 = vld [vmem:[%s1632_s1 + $0x188] sm:$0xff]   ;;  %v1284_v47 = vld [vmem:[%s1632_s1 + $0x190] sm:$0xff]   ;;  %v1287_v50 = vld [vmem:[%s1632_s1 + $0x1d8] sm:$0xff]  }
  0x12   :  { %1129 = vmatprep.subr.bf16.mxu1 %v1253_v18  ;;  %v1288_v51 = vld [vmem:[%s1632_s1 + $0x198] sm:$0xff]   ;;  %v1289_v52 = vld [vmem:[%s1632_s1 + $0x160] sm:$0xff]   ;;  %v1293_v56 = vld [vmem:[%s1632_s1 + $0x168] sm:$0xff]  }
  0x13   :  { %1102 = vmatpush3.bf16.msra.mxu0 %v1252_v17  ;;  %v1290_v53 = vld [vmem:[%s1632_s1 + $0x120] sm:$0xff]   ;;  %v1294_v57 = vld [vmem:[%s1633_s0 + $0x4c] ss:$36 sps:$4 sm:$0xff]   ;;  %v1299_v61 = vld [vmem:[%s1633_s0 + $0x54] ss:$36 sps:$4 sm:$0xff]  }
  0x14   :  { %1103 = vmatprep.subr.bf16.mxu0 %v1255_v20  ;;  %v1291_v54 = vld [vmem:[%s1632_s1 + $0x1e0] sm:$0xff]   ;;  %v1296_v58 = vld [vmem:[%s1632_s1 + $0x128] sm:$0xff]   ;;  %v1302_v63 = vld [vmem:[%s1633_s0 + $0x50] ss:$36 sps:$4 sm:$0xff]  }
  0x15   :  { %1130 = vmatpush3.bf16.msra.mxu1 %v1254_v19  ;;  %v1292_v55 = vld [vmem:[%s1632_s1 + $0x1a0] sm:$0xff]   ;;  %v1297_v59 = vld [vmem:[%s1633_s0 + $0x48] ss:$36 sps:$4 sm:$0xff]   ;;  %v1303_v0 = vld [vmem:[%s1632_s1 + $0x170] sm:$0xff]  }
  0x16   :  { %1131 = vmatprep.subr.bf16.mxu1 %v1257_v22  ;;  %v1298_v60 = vld [vmem:[%s1632_s1 + $0x1e8] sm:$0xff]   ;;  %v1304_v1 = vld [vmem:[%s1632_s1 + $0x130] sm:$0xff]   ;;  %v1307_v4 = vld [vmem:[%s1632_s1 + $0x178] sm:$0xff]  }
  0x17   :  { %1104 = vmatpush3.bf16.msra.mxu0 %v1256_v21  ;;  %v1301_v62 = vld [vmem:[%s1632_s1 + $0x1a8] sm:$0xff]   ;;  %v1305_v2 = vld [vmem:[%s1632_s1 + $0x1f0] sm:$0xff]   ;;  %v1308_v5 = vld [vmem:[%s1632_s1 + $0x138] sm:$0xff]  }
  0x18   :  { %1105 = vmatprep.subr.bf16.mxu0 %v1259_v24  ;;  %v1306_v3 = vld [vmem:[%s1632_s1 + $0x1b0] sm:$0xff]   ;;  %v1309_v6 = vld [vmem:[%s1632_s1 + $0x1f8] sm:$0xff]   ;;  %v1314_v10 = vld [vmem:[%s1632_s1 + $0x200] sm:$0xff]  }
  0x19   :  { %1132 = vmatpush3.bf16.msra.mxu1 %v1258_v23  ;;  %v1310_v7 = vld [vmem:[%s1633_s0 + $0x10] ss:$36 sps:$4 sm:$0xff]   ;;  %v1313_v9 = vld [vmem:[%s1632_s1 + $0x1b8] sm:$0xff]   ;;  %v1318_v13 = vld [vmem:[%s1632_s1 + $0x208] sm:$0xff]  }
  0x1a   :  { %1133 = vmatprep.subr.bf16.mxu1 %v1261_v26  ;;  %v1312_v8 = vld [vmem:[%s1633_s0 + $0x14] ss:$36 sps:$4 sm:$0xff]   ;;  %v1317_v12 = vld [vmem:[%s1633_s0 + $0x1c] ss:$36 sps:$4 sm:$0xff]   ;;  %v1323_v17 = vld [vmem:[%s1633_s0 + $0x64] ss:$36 sps:$4 sm:$0xff]  }
  0x1b   :  { %1106 = vmatpush3.bf16.msra.mxu0 %v1260_v25  ;;  %v1315_v11 = vld [vmem:[%s1633_s0 + $0x18] ss:$36 sps:$4 sm:$0xff]   ;;  %v1322_v16 = vld [vmem:[%s1632_s1 + $0x210] sm:$0xff]   ;;  %v1325_v18 = vld [vmem:[%s1633_s0 + $0x60] ss:$36 sps:$4 sm:$0xff]  }
  0x1c   :  { %1107 = vmatprep.subr.bf16.mxu0 %v1263_v28  ;;  %v1319_v14 = vld [vmem:[%s1633_s0 + $0x5c] ss:$36 sps:$4 sm:$0xff]   ;;  %v1328_v22 = vld [vmem:[%s1632_s1 + $0x228] sm:$0xff]   ;;  %v1329_v23 = vld [vmem:[%s1632_s1 + $0x230] sm:$0xff]  }
  0x1d   :  { %1134 = vmatpush3.bf16.msra.mxu1 %v1262_v27  ;;  %v1321_v15 = vld [vmem:[%s1633_s0 + $0x58] ss:$36 sps:$4 sm:$0xff]   ;;  %v1327_v20 = vld [vmem:[%s1632_s1 + $0x220] sm:$0xff]   ;;  %v1332_v25 = vld [vmem:[%s1633_s0 + $0x68] ss:$36 sps:$4 sm:$0xff]  }
  0x1e   :  { %1135 = vmatprep.subr.bf16.mxu1 %v1265_v30  ;;  %v1326_v19 = vld [vmem:[%s1632_s1 + $0x218] sm:$0xff]   ;;  %v1331_v21 = vld [vmem:[%s1633_s0 + $0x20] ss:$36 sps:$4 sm:$0xff]  }
  0x1f   :  { %1108 = vmatpush3.bf16.msra.mxu0 %v1264_v29  ;;  %v1330_v24 = vld [vmem:[%s1632_s1 + $0x238] sm:$0xff]   ;;  %v983_v27 = vld [vmem:[%s1634_s2] ss:$0 sm:$0xff] }
  0x20   :  { %1149 = vmatprep.subr.bf16.mxu0 %v1270_v34 }
  0x21   :  { %1136 = vmatpush3.bf16.msra.mxu1 %v1269_v33 }
  0x22   :  { %743 = vmatmul.mubr.bf16.vlgmr.msra.gmra.mrb[0].mxu0 %v1266_v31  ;;  %1177 = vmatprep.subr.bf16.mxu1 %v1275_v38 }
  0x23   :  { %1150 = vmatpush3.bf16.msra.mxu0 %v1274_v37  ;;  %750 = vmatprep.mubr.bf16.mxu0 %v1294_v57 }
  0x24   :  { %792 = vmatmul.mubr.bf16.vlgmr.msra.gmra.mrb[0].mxu1 %v1271_v35  ;;  %1151 = vmatprep.subr.bf16.mxu0 %v1277_v40 }
  0x25   :  { %1178 = vmatpush3.bf16.msra.mxu1 %v1276_v39  ;;  %799 = vmatprep.mubr.bf16.mxu1 %v1299_v61 }
  0x26   :  { %1179 = vmatprep.subr.bf16.mxu1 %v1279_v42 }
  0x27   :  { %1152 = vmatpush3.bf16.msra.mxu0 %v1278_v41 }
  0x28   :  { %1153 = vmatprep.subr.bf16.mxu0 %v1281_v44 }
  0x29   :  { %1180 = vmatpush3.bf16.msra.mxu1 %v1280_v43 }
  0x2a   :  { %1181 = vmatprep.subr.bf16.mxu1 %v1283_v46  ;;  %751 = vmatmul.mubr.bf16.gmra.mrb[4].mxu0 %v1297_v59 }
  0x2b   :  { %1154 = vmatpush3.bf16.msra.mxu0 %v1282_v45  ;;  %840 = vmatprep.mubr.bf16.mxu0 %v1312_v8 }
  0x2c   :  { %1155 = vmatprep.subr.bf16.mxu0 %v1285_v48  ;;  %800 = vmatmul.mubr.bf16.gmra.mrb[4].mxu1 %v1302_v63 }
  0x2d   :  { %1182 = vmatpush3.bf16.msra.mxu1 %v1284_v47  ;;  %889 = vmatprep.mubr.bf16.mxu1 %v1317_v12 }
  0x2e   :  { %1183 = vmatprep.subr.bf16.mxu1 %v1287_v50 }
  0x2f   :  { %1156 = vmatpush3.bf16.msra.mxu0 %v1286_v49 }
  0x30   :  { %1157 = vmatprep.subr.bf16.mxu0 %v1289_v52 }
  0x31   :  { %1184 = vmatpush3.bf16.msra.mxu1 %v1288_v51 }
  0x32   :  { %1185 = vmatprep.subr.bf16.mxu1 %v1291_v54 }
  0x33   :  { %1158 = vmatpush3.bf16.msra.mxu0 %v1290_v53 }
  0x34   :  { %1159 = vmatprep.subr.bf16.mxu0 %v1293_v56 }
  0x35   :  { %1186 = vmatpush3.bf16.msra.mxu1 %v1292_v55 }
  0x36   :  { %1187 = vmatprep.subr.bf16.mxu1 %v1298_v60 }
  0x37   :  { %1160 = vmatpush3.bf16.msra.mxu0 %v1296_v58 }
  0x38   :  { %1161 = vmatprep.subr.bf16.mxu0 %v1303_v0 }
  0x39   :  { %1188 = vmatpush3.bf16.msra.mxu1 %v1301_v62 }
  0x3a   :  { %1189 = vmatprep.subr.bf16.mxu1 %v1305_v2 }
  0x3b   :  { %1162 = vmatpush3.bf16.msra.mxu0 %v1304_v1 }
  0x3c   :  { %1163 = vmatprep.subr.bf16.mxu0 %v1307_v4 }
  0x3d   :  { %1190 = vmatpush3.bf16.msra.mxu1 %v1306_v3 }
  0x3e   :  { %1191 = vmatprep.subr.bf16.mxu1 %v1309_v6 }
  0x3f   :  { %1164 = vmatpush3.bf16.msra.mxu0 %v1308_v5 }
  0x40   :  { %1215 = vmatprep.subr.bf16.mxu0 %v1314_v10 }
  0x41   :  { %1192 = vmatpush3.bf16.msra.mxu1 %v1313_v9 }
  0x42   :  { %841 = vmatmul.mubr.bf16.vlgmr.msra.gmra.mrb[8].mxu0 %v1310_v7 }
  0x43   :  { %1216 = vmatpush3.bf16.msra.mxu0 %v1314_v10  ;;  %848 = vmatprep.mubr.bf16.mxu0 %v1319_v14 }
  0x44   :  { %890 = vmatmul.mubr.bf16.vlgmr.msra.gmra.mrb[8].mxu1 %v1315_v11  ;;  %1217 = vmatprep.subr.bf16.mxu0 %v1318_v13 }
  0x45   :  { %897 = vmatprep.mubr.bf16.mxu1 %v1323_v17 }
  0x47   :  { %1218 = vmatpush3.bf16.msra.mxu0 %v1318_v13 }
  0x48   :  { %1219 = vmatprep.subr.bf16.mxu0 %v1322_v16 }
  0x4a   :  { %849 = vmatmul.mubr.bf16.gmra.mrb[12].mxu0 %v1321_v15 }
  0x4b   :  { %1220 = vmatpush3.bf16.msra.mxu0 %v1322_v16  ;;  %1231 = vmatprep.mubr.bf16.mxu0 %v1331_v21 }
  0x4c   :  { %898 = vmatmul.mubr.bf16.gmra.mrb[12].mxu1 %v1325_v18  ;;  %1221 = vmatprep.subr.bf16.mxu0 %v1326_v19 }
  0x4f   :  { %1222 = vmatpush3.bf16.msra.mxu0 %v1326_v19 }
  0x50   :  { %1223 = vmatprep.subr.bf16.mxu0 %v1327_v20 }
  0x53   :  { %1224 = vmatpush3.bf16.msra.mxu0 %v1327_v20 }
  0x54   :  { %1225 = vmatprep.subr.bf16.mxu0 %v1328_v22 }
  0x57   :  { %1226 = vmatpush3.bf16.msra.mxu0 %v1328_v22 }
  0x58   :  { %1227 = vmatprep.subr.bf16.mxu0 %v1329_v23 }
  0x5b   :  { %1228 = vmatpush3.bf16.msra.mxu0 %v1329_v23 }
  0x5c   :  { %1229 = vmatprep.subr.bf16.mxu0 %v1330_v24 }
  0x5f   :  { %1230 = vmatpush3.bf16.msra.mxu0 %v1330_v24 }
  0x62   :  { %1232 = vmatmul.mubr.bf16.vlgmr.msra.gmra.mrb[16].mxu0 %v1332_v25 }
  0xf5   :  { %v1109_v26 = vpop.f32.mrb[0].mxu0 }
  0xf6   :  { %v1110_v28 = vpop.f32.mrb[1].mxu0 }
  0xf7   :  { %v1111_v29 = vadd.f32 %v1110_v28, %v1109_v26  ;;  %v1112_v30 = vpop.f32.mrb[2].mxu0  ;;  %v1137_v31 = vpop.f32.mrb[0].mxu1 }
  0xf8   :  { %v1113_v32 = vpop.f32.mrb[3].mxu0  ;;  %v1138_v35 = vpop.f32.mrb[1].mxu1 }
  0xf9   :  { %v745_v33 = vadd.f32 %v1111_v29, %v983_v27  ;;  %v1114_v34 = vadd.f32 %v1113_v32, %v1112_v30  ;;  %v1139_v36 = vadd.f32 %v1138_v35, %v1137_v31  ;;  %v1140_v37 = vpop.f32.mrb[2].mxu1 }
  0xfa   :  { %v1141_v39 = vpop.f32.mrb[3].mxu1 }
  0xfb   :  { %v748_v38 = vadd.f32 %v1114_v34, %v983_v27  ;;  %v794_v40 = vadd.f32 %v1139_v36, %v745_v33  ;;  %v1142_v41 = vadd.f32 %v1141_v39, %v1140_v37 }
  0xfd   :  { %v797_v42 = vadd.f32 %v1142_v41, %v748_v38  ;;  %v1115_v43 = vpop.f32.mrb[4].mxu0 }
  0xfe   :  { %v1116_v44 = vpop.f32.mrb[5].mxu0 }
  0xff   :  { %v1117_v45 = vadd.f32 %v1116_v44, %v1115_v43  ;;  %v1118_v46 = vpop.f32.mrb[6].mxu0  ;;  %v1143_v47 = vpop.f32.mrb[4].mxu1 }
 0x100   :  { %v1119_v48 = vpop.f32.mrb[7].mxu0  ;;  %v1144_v51 = vpop.f32.mrb[5].mxu1 }
 0x101   :  { %v753_v49 = vadd.f32 %v1117_v45, %v983_v27  ;;  %v1120_v50 = vadd.f32 %v1119_v48, %v1118_v46  ;;  %v1145_v52 = vadd.f32 %v1144_v51, %v1143_v47  ;;  %v1146_v53 = vpop.f32.mrb[6].mxu1 }
 0x102   :  { %v1147_v55 = vpop.f32.mrb[7].mxu1 }
 0x103   :  { %v756_v54 = vadd.f32 %v1120_v50, %v983_v27  ;;  %v802_v56 = vadd.f32 %v1145_v52, %v753_v49  ;;  %v1148_v57 = vadd.f32 %v1147_v55, %v1146_v53 }
 0x105   :  { %v805_v58 = vadd.f32 %v1148_v57, %v756_v54 }
 0x115   :  { %v1165_v59 = vpop.f32.mrb[8].mxu0 }
 0x116   :  { %v1166_v60 = vpop.f32.mrb[9].mxu0 }
 0x117   :  { %v1167_v61 = vadd.f32 %v1166_v60, %v1165_v59  ;;  %v1168_v62 = vpop.f32.mrb[10].mxu0  ;;  %v1193_v63 = vpop.f32.mrb[8].mxu1 }
 0x118   :  { %v1169_v0 = vpop.f32.mrb[11].mxu0  ;;  %v1194_v3 = vpop.f32.mrb[9].mxu1 }
 0x119   :  { %v843_v1 = vadd.f32 %v1167_v61, %v794_v40  ;;  %v1170_v2 = vadd.f32 %v1169_v0, %v1168_v62  ;;  %v1195_v4 = vadd.f32 %v1194_v3, %v1193_v63  ;;  %v1196_v5 = vpop.f32.mrb[10].mxu1 }
 0x11a   :  { %v1197_v7 = vpop.f32.mrb[11].mxu1 }
 0x11b   :  { %v846_v6 = vadd.f32 %v1170_v2, %v797_v42  ;;  %v1198_v8 = vadd.f32 %v1197_v7, %v1196_v5  ;;  %v892_v9 = vadd.f32 %v1195_v4, %v843_v1 }
 0x11d   :  { %v1171_v10 = vpop.f32.mrb[12].mxu0  ;;  %v895_v12 = vadd.f32 %v1198_v8, %v846_v6 }
 0x11e   :  { %v1172_v11 = vpop.f32.mrb[13].mxu0 }
 0x11f   :  { %v1173_v13 = vadd.f32 %v1172_v11, %v1171_v10  ;;  %v1174_v14 = vpop.f32.mrb[14].mxu0  ;;  %v1199_v15 = vpop.f32.mrb[12].mxu1 }
 0x120   :  { %v1175_v16 = vpop.f32.mrb[15].mxu0  ;;  %v1200_v19 = vpop.f32.mrb[13].mxu1 }
 0x121   :  { %v851_v17 = vadd.f32 %v1173_v13, %v802_v56  ;;  %v1176_v18 = vadd.f32 %v1175_v16, %v1174_v14  ;;  %v1201_v20 = vadd.f32 %v1200_v19, %v1199_v15  ;;  %v1202_v21 = vpop.f32.mrb[14].mxu1 }
 0x122   :  { %v1203_v23 = vpop.f32.mrb[15].mxu1 }
 0x123   :  { %v854_v22 = vadd.f32 %v1176_v18, %v805_v58  ;;  %v1204_v24 = vadd.f32 %v1203_v23, %v1202_v21  ;;  %v900_v25 = vadd.f32 %v1201_v20, %v851_v17 }
 0x125   :  { %v903_v26 = vadd.f32 %v1204_v24, %v854_v22 }
 0x135   :  { %v1233_v27 = vpop.f32.mrb[16].mxu0 }
 0x136   :  { %v949_v28 = vadd.f32 %v1233_v27, %v900_v25  ;;  %v940_v29 = vpop.f32.mrb[17].mxu0 }
 0x137   :  { %v941_v30 = vadd.f32 %v940_v29, %v892_v9  ;;  %v1234_v31 = vpop.f32.mrb[18].mxu0 }
 0x138   :  { %v952_v32 = vadd.f32 %v1234_v31, %v903_v26  ;;  %v943_v33 = vpop.f32.mrb[19].mxu0  ;;  %v957_v35 = vmax.f32 %v949_v28, 0.0 }
 0x139   :  { %v944_v34 = vadd.f32 %v943_v33, %v895_v12  ;;  %v955_v37 = vmax.f32 %v941_v30, 0.0 }
 0x13a   :  { %v958_v36 = vmax.f32 %v952_v32, 0.0 }
 0x13b   :  { %v956_v38 = vmax.f32 %v944_v34, 0.0 }
 0x13c   :  { %v1090_v39 = vpack.c.bf16 %v958_v36, %v957_v35 }
 0x13d   :  { %v1085_v40 = vpack.c.bf16 %v956_v38, %v955_v37 }
 0x13e   :  { %1092 = vst [vmem:[%s1635_s3 + $0x8] sm:$0xff] %v1090_v39  }
 0x13f   :  { %1086 = vst [vmem:[%s1635_s3] sm:$0xff] %v1085_v40  }

// kernel: unet_forward.10
= control target key start
LH: loop header
LB: loop body
LE: loop exit
PB: predicated region body
PF: predicated region fallthrough
CT: control target
= control target key end

     0   :  { %s2299_s1 = inlined_call_operand.vmem [shape: bf16[1152,256], index: 1, kind: input, shape index: {}]   ;;  %s2300_s0 = inlined_call_operand.vmem [shape: bf16[32,1152], index: 0, kind: input, shape index: {}]   ;;  %s2301_s2 = inlined_call_operand.vmem [shape: f32[1,256], index: 2, kind: input, shape index: {}]   ;;  %s2302_s3 = inlined_call_operand.vmem [shape: bf16[32,256], index: 3, kind: output, shape index: {}]  }
   0x1   :  { %v1535_v0 = vld [vmem:[%s2299_s1 + $0x4] ss:$8 sps:$4 sm:$0xff]   ;;  %v1539_v2 = vld [vmem:[%s2299_s1] ss:$8 sps:$4 sm:$0xff]   ;;  %v1541_v4 = vld [vmem:[%s2299_s1 + $0x14] ss:$8 sps:$4 sm:$0xff]  }
   0x2   :  { %v1537_v1 = vld [vmem:[%s2299_s1 + $0x204] ss:$8 sps:$4 sm:$0xff]   ;;  %1003 = vmatprep.subr.bf16.mxu1 %v1535_v0  ;;  %v1540_v3 = vld [vmem:[%s2299_s1 + $0x200] ss:$8 sps:$4 sm:$0xff]   ;;  %v1543_v5 = vld [vmem:[%s2299_s1 + $0x214] ss:$8 sps:$4 sm:$0xff]  }
   0x3   :  { %1109 = vmatprep.subr.bf16.mxu0 %v1537_v1  ;;  %1004 = vmatpush1.bf16.msra.mxu1 %v1539_v2  ;;  %v1545_v6 = vld [vmem:[%s2299_s1 + $0x10] ss:$8 sps:$4 sm:$0xff]   ;;  %v1547_v8 = vld [vmem:[%s2299_s1 + $0x24] ss:$8 sps:$4 sm:$0xff]   ;;  %v1551_v10 = vld [vmem:[%s2299_s1 + $0x20] ss:$8 sps:$4 sm:$0xff]  }
   0x4   :  { %1110 = vmatpush1.bf16.msra.mxu0 %v1540_v3  ;;  %1005 = vmatprep.subr.bf16.mxu1 %v1541_v4  ;;  %v1546_v7 = vld [vmem:[%s2299_s1 + $0x210] ss:$8 sps:$4 sm:$0xff]   ;;  %v1549_v9 = vld [vmem:[%s2299_s1 + $0x224] ss:$8 sps:$4 sm:$0xff]   ;;  %v1552_v11 = vld [vmem:[%s2299_s1 + $0x220] ss:$8 sps:$4 sm:$0xff]  }
   0x5   :  { %1111 = vmatprep.subr.bf16.mxu0 %v1543_v5  ;;  %v1553_v12 = vld [vmem:[%s2299_s1 + $0x34] ss:$8 sps:$4 sm:$0xff]   ;;  %v1557_v14 = vld [vmem:[%s2299_s1 + $0x30] ss:$8 sps:$4 sm:$0xff]   ;;  %v1559_v16 = vld [vmem:[%s2299_s1 + $0x44] ss:$8 sps:$4 sm:$0xff]  }
   0x6   :  { %v1555_v13 = vld [vmem:[%s2299_s1 + $0x234] ss:$8 sps:$4 sm:$0xff]   ;;  %v1558_v15 = vld [vmem:[%s2299_s1 + $0x230] ss:$8 sps:$4 sm:$0xff]   ;;  %v1561_v17 = vld [vmem:[%s2299_s1 + $0x244] ss:$8 sps:$4 sm:$0xff]  }
   0x7   :  { %1006 = vmatpush1.bf16.msra.mxu1 %v1545_v6  ;;  %v1563_v18 = vld [vmem:[%s2299_s1 + $0x40] ss:$8 sps:$4 sm:$0xff]   ;;  %v1565_v20 = vld [vmem:[%s2299_s1 + $0x54] ss:$8 sps:$4 sm:$0xff]   ;;  %v1569_v22 = vld [vmem:[%s2299_s1 + $0x50] ss:$8 sps:$4 sm:$0xff]  }
   0x8   :  { %1112 = vmatpush1.bf16.msra.mxu0 %v1546_v7  ;;  %1007 = vmatprep.subr.bf16.mxu1 %v1547_v8  ;;  %v1564_v19 = vld [vmem:[%s2299_s1 + $0x240] ss:$8 sps:$4 sm:$0xff]   ;;  %v1567_v21 = vld [vmem:[%s2299_s1 + $0x254] ss:$8 sps:$4 sm:$0xff]   ;;  %v1570_v23 = vld [vmem:[%s2299_s1 + $0x250] ss:$8 sps:$4 sm:$0xff]  }
   0x9   :  { %1113 = vmatprep.subr.bf16.mxu0 %v1549_v9  ;;  %v1571_v24 = vld [vmem:[%s2299_s1 + $0x64] ss:$8 sps:$4 sm:$0xff]   ;;  %v1575_v26 = vld [vmem:[%s2299_s1 + $0x60] ss:$8 sps:$4 sm:$0xff]   ;;  %v1577_v28 = vld [vmem:[%s2299_s1 + $0x74] ss:$8 sps:$4 sm:$0xff]  }
   0xa   :  { %v1573_v25 = vld [vmem:[%s2299_s1 + $0x264] ss:$8 sps:$4 sm:$0xff]   ;;  %v1576_v27 = vld [vmem:[%s2299_s1 + $0x260] ss:$8 sps:$4 sm:$0xff]   ;;  %v1579_v29 = vld [vmem:[%s2299_s1 + $0x274] ss:$8 sps:$4 sm:$0xff]  }
   0xb   :  { %1008 = vmatpush1.bf16.msra.mxu1 %v1551_v10  ;;  %v1581_v30 = vld [vmem:[%s2299_s1 + $0x70] ss:$8 sps:$4 sm:$0xff]   ;;  %v1583_v32 = vld [vmem:[%s2299_s1 + $0x84] ss:$8 sps:$4 sm:$0xff]   ;;  %v1587_v34 = vld [vmem:[%s2299_s1 + $0x80] ss:$8 sps:$4 sm:$0xff]  }
   0xc   :  { %1114 = vmatpush1.bf16.msra.mxu0 %v1552_v11  ;;  %1009 = vmatprep.subr.bf16.mxu1 %v1553_v12  ;;  %v1582_v31 = vld [vmem:[%s2299_s1 + $0x270] ss:$8 sps:$4 sm:$0xff]   ;;  %v1585_v33 = vld [vmem:[%s2299_s1 + $0x284] ss:$8 sps:$4 sm:$0xff]   ;;  %v1588_v35 = vld [vmem:[%s2299_s1 + $0x280] ss:$8 sps:$4 sm:$0xff]  }
   0xd   :  { %1115 = vmatprep.subr.bf16.mxu0 %v1555_v13  ;;  %v1589_v36 = vld [vmem:[%s2299_s1 + $0x94] ss:$8 sps:$4 sm:$0xff]   ;;  %v1593_v38 = vld [vmem:[%s2299_s1 + $0x90] ss:$8 sps:$4 sm:$0xff]   ;;  %v1595_v40 = vld [vmem:[%s2299_s1 + $0xa4] ss:$8 sps:$4 sm:$0xff]  }
   0xe   :  { %v1591_v37 = vld [vmem:[%s2299_s1 + $0x294] ss:$8 sps:$4 sm:$0xff]   ;;  %v1594_v39 = vld [vmem:[%s2299_s1 + $0x290] ss:$8 sps:$4 sm:$0xff]   ;;  %v1597_v41 = vld [vmem:[%s2299_s1 + $0x2a4] ss:$8 sps:$4 sm:$0xff]  }
   0xf   :  { %1010 = vmatpush1.bf16.msra.mxu1 %v1557_v14  ;;  %v1599_v42 = vld [vmem:[%s2299_s1 + $0xa0] ss:$8 sps:$4 sm:$0xff]   ;;  %v1601_v44 = vld [vmem:[%s2299_s1 + $0xb4] ss:$8 sps:$4 sm:$0xff]   ;;  %v1605_v46 = vld [vmem:[%s2299_s1 + $0xb0] ss:$8 sps:$4 sm:$0xff]  }
  0x10   :  { %1116 = vmatpush1.bf16.msra.mxu0 %v1558_v15  ;;  %1011 = vmatprep.subr.bf16.mxu1 %v1559_v16  ;;  %v1600_v43 = vld [vmem:[%s2299_s1 + $0x2a0] ss:$8 sps:$4 sm:$0xff]   ;;  %v1603_v45 = vld [vmem:[%s2299_s1 + $0x2b4] ss:$8 sps:$4 sm:$0xff]   ;;  %v1606_v47 = vld [vmem:[%s2299_s1 + $0x2b0] ss:$8 sps:$4 sm:$0xff]  }
  0x11   :  { %1117 = vmatprep.subr.bf16.mxu0 %v1561_v17  ;;  %v1633_v48 = vld [vmem:[%s2300_s0 + $0x4] ss:$36 sps:$4 sm:$0xff]   ;;  %v1639_v51 = vld [vmem:[%s2300_s0 + $0x14] ss:$36 sps:$4 sm:$0xff]  }
  0x12   :  { %v1607_v49 = vld [vmem:[%s2299_s1 + $0xc4] ss:$8 sps:$4 sm:$0xff]   ;;  %1035 = vmatprep.mubr.bf16.mxu1 %v1633_v48  ;;  %v1611_v52 = vld [vmem:[%s2299_s1 + $0xc0] ss:$8 sps:$4 sm:$0xff]   ;;  %v1613_v54 = vld [vmem:[%s2299_s1 + $0xd4] ss:$8 sps:$4 sm:$0xff]   ;;  %1141 = vmatprep.mubr.bf16.mxu0 %v1639_v51 }
  0x13   :  { %1012 = vmatpush1.bf16.msra.mxu1 %v1563_v18  ;;  %v1609_v50 = vld [vmem:[%s2299_s1 + $0x2c4] ss:$8 sps:$4 sm:$0xff]   ;;  %v1612_v53 = vld [vmem:[%s2299_s1 + $0x2c0] ss:$8 sps:$4 sm:$0xff]   ;;  %v1615_v55 = vld [vmem:[%s2299_s1 + $0x2d4] ss:$8 sps:$4 sm:$0xff]  }
  0x14   :  { %1118 = vmatpush1.bf16.msra.mxu0 %v1564_v19  ;;  %1013 = vmatprep.subr.bf16.mxu1 %v1565_v20  ;;  %v1617_v56 = vld [vmem:[%s2299_s1 + $0xd0] ss:$8 sps:$4 sm:$0xff]   ;;  %v1619_v58 = vld [vmem:[%s2299_s1 + $0xe4] ss:$8 sps:$4 sm:$0xff]   ;;  %v1623_v60 = vld [vmem:[%s2299_s1 + $0xe0] ss:$8 sps:$4 sm:$0xff]  }
  0x15   :  { %1119 = vmatprep.subr.bf16.mxu0 %v1567_v21  ;;  %v1618_v57 = vld [vmem:[%s2299_s1 + $0x2d0] ss:$8 sps:$4 sm:$0xff]   ;;  %v1621_v59 = vld [vmem:[%s2299_s1 + $0x2e4] ss:$8 sps:$4 sm:$0xff]   ;;  %v1624_v61 = vld [vmem:[%s2299_s1 + $0x2e0] ss:$8 sps:$4 sm:$0xff]  }
  0x16   :  { %v1625_v62 = vld [vmem:[%s2299_s1 + $0xf4] ss:$8 sps:$4 sm:$0xff]   ;;  %v1629_v0 = vld [vmem:[%s2299_s1 + $0xf0] ss:$8 sps:$4 sm:$0xff]   ;;  %v1636_v2 = vld [vmem:[%s2299_s1 + $0x104] ss:$8 sps:$4 sm:$0xff]  }
  0x17   :  { %1014 = vmatpush1.bf16.msra.mxu1 %v1569_v22  ;;  %v1627_v63 = vld [vmem:[%s2299_s1 + $0x2f4] ss:$8 sps:$4 sm:$0xff]   ;;  %v1630_v1 = vld [vmem:[%s2299_s1 + $0x2f0] ss:$8 sps:$4 sm:$0xff]   ;;  %v1642_v3 = vld [vmem:[%s2299_s1 + $0x304] ss:$8 sps:$4 sm:$0xff]  }
  0x18   :  { %1120 = vmatpush1.bf16.msra.mxu0 %v1570_v23  ;;  %1015 = vmatprep.subr.bf16.mxu1 %v1571_v24  ;;  %v1631_v4 = vld [vmem:[%s2300_s0] ss:$36 sps:$4 sm:$0xff]   ;;  %v1637_v6 = vld [vmem:[%s2300_s0 + $0x10] ss:$36 sps:$4 sm:$0xff]  }
  0x19   :  { %1121 = vmatprep.subr.bf16.mxu0 %v1573_v25  ;;  %v1634_v5 = vld [vmem:[%s2299_s1 + $0x100] ss:$8 sps:$4 sm:$0xff]   ;;  %v1645_v8 = vld [vmem:[%s2299_s1 + $0x114] ss:$8 sps:$4 sm:$0xff]   ;;  %v1643_v10 = vld [vmem:[%s2299_s1 + $0x110] ss:$8 sps:$4 sm:$0xff]  }
  0x1a   :  { %v1640_v7 = vld [vmem:[%s2299_s1 + $0x300] ss:$8 sps:$4 sm:$0xff]   ;;  %v1648_v9 = vld [vmem:[%s2299_s1 + $0x314] ss:$8 sps:$4 sm:$0xff]   ;;  %v1646_v11 = vld [vmem:[%s2299_s1 + $0x310] ss:$8 sps:$4 sm:$0xff]  }
  0x1b   :  { %1016 = vmatpush1.bf16.msra.mxu1 %v1575_v26  ;;  %v1651_v12 = vld [vmem:[%s2299_s1 + $0x124] ss:$8 sps:$4 sm:$0xff]   ;;  %v1649_v14 = vld [vmem:[%s2299_s1 + $0x120] ss:$8 sps:$4 sm:$0xff]   ;;  %v1657_v16 = vld [vmem:[%s2299_s1 + $0x134] ss:$8 sps:$4 sm:$0xff]  }
  0x1c   :  { %1122 = vmatpush1.bf16.msra.mxu0 %v1576_v27  ;;  %1017 = vmatprep.subr.bf16.mxu1 %v1577_v28  ;;  %v1654_v13 = vld [vmem:[%s2299_s1 + $0x324] ss:$8 sps:$4 sm:$0xff]   ;;  %v1652_v15 = vld [vmem:[%s2299_s1 + $0x320] ss:$8 sps:$4 sm:$0xff]   ;;  %v1660_v17 = vld [vmem:[%s2299_s1 + $0x334] ss:$8 sps:$4 sm:$0xff]  }
  0x1d   :  { %1123 = vmatprep.subr.bf16.mxu0 %v1579_v29  ;;  %v1655_v18 = vld [vmem:[%s2299_s1 + $0x130] ss:$8 sps:$4 sm:$0xff]   ;;  %v1663_v20 = vld [vmem:[%s2299_s1 + $0x144] ss:$8 sps:$4 sm:$0xff]   ;;  %v1661_v22 = vld [vmem:[%s2299_s1 + $0x140] ss:$8 sps:$4 sm:$0xff]  }
  0x1e   :  { %v1658_v19 = vld [vmem:[%s2299_s1 + $0x330] ss:$8 sps:$4 sm:$0xff]   ;;  %v1666_v21 = vld [vmem:[%s2299_s1 + $0x344] ss:$8 sps:$4 sm:$0xff]   ;;  %v1664_v23 = vld [vmem:[%s2299_s1 + $0x340] ss:$8 sps:$4 sm:$0xff]  }
  0x1f   :  { %1018 = vmatpush1.bf16.msra.mxu1 %v1581_v30  ;;  %v1669_v24 = vld [vmem:[%s2299_s1 + $0x154] ss:$8 sps:$4 sm:$0xff]   ;;  %v1667_v26 = vld [vmem:[%s2299_s1 + $0x150] ss:$8 sps:$4 sm:$0xff]   ;;  %v1675_v28 = vld [vmem:[%s2299_s1 + $0x164] ss:$8 sps:$4 sm:$0xff]  }
  0x20   :  { %1124 = vmatpush1.bf16.msra.mxu0 %v1582_v31  ;;  %1019 = vmatprep.subr.bf16.mxu1 %v1583_v32  ;;  %v1672_v25 = vld [vmem:[%s2299_s1 + $0x354] ss:$8 sps:$4 sm:$0xff]   ;;  %v1670_v27 = vld [vmem:[%s2299_s1 + $0x350] ss:$8 sps:$4 sm:$0xff]   ;;  %v1725_v31 = vld [vmem:[%s2300_s0 + $0x48] ss:$36 sps:$4 sm:$0xff]  }
  0x21   :  { %1125 = vmatprep.subr.bf16.mxu0 %v1585_v33  ;;  %v1721_v29 = vld [vmem:[%s2300_s0 + $0x4c] ss:$36 sps:$4 sm:$0xff]   ;;  %v1723_v30 = vld [vmem:[%s2300_s0 + $0x5c] ss:$36 sps:$4 sm:$0xff]  }
  0x22   :  { %v1678_v32 = vld [vmem:[%s2299_s1 + $0x364] ss:$8 sps:$4 sm:$0xff]   ;;  %v1729_v33 = vld [vmem:[%s2300_s0 + $0x58] ss:$36 sps:$4 sm:$0xff]  }
  0x23   :  { %1020 = vmatpush1.bf16.msra.mxu1 %v1587_v34  ;;  %v1673_v34 = vld [vmem:[%s2299_s1 + $0x160] ss:$8 sps:$4 sm:$0xff]   ;;  %v1691_v48 = vld [vmem:[%s2299_s1 + $0x190] ss:$8 sps:$4 sm:$0xff]   ;;  %v1702_v51 = vld [vmem:[%s2299_s1 + $0x3a4] ss:$8 sps:$4 sm:$0xff]  }
  0x24   :  { %1126 = vmatpush1.bf16.msra.mxu0 %v1588_v35  ;;  %1021 = vmatprep.subr.bf16.mxu1 %v1589_v36  ;;  %v1676_v35 = vld [vmem:[%s2299_s1 + $0x360] ss:$8 sps:$4 sm:$0xff]   ;;  %v1681_v36 = vld [vmem:[%s2299_s1 + $0x174] ss:$8 sps:$4 sm:$0xff]  }
  0x25   :  { %1127 = vmatprep.subr.bf16.mxu0 %v1591_v37  ;;  %v1684_v37 = vld [vmem:[%s2299_s1 + $0x374] ss:$8 sps:$4 sm:$0xff]  }
  0x27   :  { %1022 = vmatpush1.bf16.msra.mxu1 %v1593_v38  ;;  %v1679_v38 = vld [vmem:[%s2299_s1 + $0x170] ss:$8 sps:$4 sm:$0xff]  }
  0x28   :  { %1128 = vmatpush1.bf16.msra.mxu0 %v1594_v39  ;;  %1023 = vmatprep.subr.bf16.mxu1 %v1595_v40  ;;  %v1682_v39 = vld [vmem:[%s2299_s1 + $0x370] ss:$8 sps:$4 sm:$0xff]   ;;  %v1687_v40 = vld [vmem:[%s2299_s1 + $0x184] ss:$8 sps:$4 sm:$0xff]  }
  0x29   :  { %1129 = vmatprep.subr.bf16.mxu0 %v1597_v41  ;;  %v1741_v41 = vld [vmem:[%s2300_s0 + $0xc] ss:$36 sps:$4 sm:$0xff]  }
  0x2b   :  { %1024 = vmatpush1.bf16.msra.mxu1 %v1599_v42  ;;  %v1690_v42 = vld [vmem:[%s2299_s1 + $0x384] ss:$8 sps:$4 sm:$0xff]  }
  0x2c   :  { %1130 = vmatpush1.bf16.msra.mxu0 %v1600_v43  ;;  %1025 = vmatprep.subr.bf16.mxu1 %v1601_v44  ;;  %v1744_v43 = vld [vmem:[%s2300_s0 + $0x1c] ss:$36 sps:$4 sm:$0xff]  }
  0x2d   :  { %1131 = vmatprep.subr.bf16.mxu0 %v1603_v45  ;;  %v1685_v44 = vld [vmem:[%s2299_s1 + $0x180] ss:$8 sps:$4 sm:$0xff]  }
  0x2e   :  { %v1688_v45 = vld [vmem:[%s2299_s1 + $0x380] ss:$8 sps:$4 sm:$0xff]  }
  0x2f   :  { %1026 = vmatpush1.bf16.msra.mxu1 %v1605_v46  ;;  %v1693_v46 = vld [vmem:[%s2299_s1 + $0x194] ss:$8 sps:$4 sm:$0xff]  }
  0x30   :  { %1132 = vmatpush1.bf16.msra.mxu0 %v1606_v47  ;;  %1027 = vmatprep.subr.bf16.mxu1 %v1607_v49  ;;  %v1696_v47 = vld [vmem:[%s2299_s1 + $0x394] ss:$8 sps:$4 sm:$0xff]   ;;  %v1694_v49 = vld [vmem:[%s2299_s1 + $0x390] ss:$8 sps:$4 sm:$0xff]  }
  0x31   :  { %1133 = vmatprep.subr.bf16.mxu0 %v1609_v50  ;;  %v1699_v50 = vld [vmem:[%s2299_s1 + $0x1a4] ss:$8 sps:$4 sm:$0xff]  }
  0x33   :  { %1028 = vmatpush1.bf16.msra.mxu1 %v1611_v52  ;;  %v1697_v52 = vld [vmem:[%s2299_s1 + $0x1a0] ss:$8 sps:$4 sm:$0xff]  }
  0x34   :  { %1134 = vmatpush1.bf16.msra.mxu0 %v1612_v53  ;;  %1029 = vmatprep.subr.bf16.mxu1 %v1613_v54  ;;  %v1700_v53 = vld [vmem:[%s2299_s1 + $0x3a0] ss:$8 sps:$4 sm:$0xff]   ;;  %v1705_v54 = vld [vmem:[%s2299_s1 + $0x1b4] ss:$8 sps:$4 sm:$0xff]  }
  0x35   :  { %1135 = vmatprep.subr.bf16.mxu0 %v1615_v55  ;;  %v1708_v55 = vld [vmem:[%s2299_s1 + $0x3b4] ss:$8 sps:$4 sm:$0xff]  }
  0x37   :  { %1030 = vmatpush1.bf16.msra.mxu1 %v1617_v56  ;;  %v1703_v56 = vld [vmem:[%s2299_s1 + $0x1b0] ss:$8 sps:$4 sm:$0xff]  }
  0x38   :  { %1136 = vmatpush1.bf16.msra.mxu0 %v1618_v57  ;;  %1031 = vmatprep.subr.bf16.mxu1 %v1619_v58  ;;  %v1706_v57 = vld [vmem:[%s2299_s1 + $0x3b0] ss:$8 sps:$4 sm:$0xff]   ;;  %v1711_v58 = vld [vmem:[%s2299_s1 + $0x1c4] ss:$8 sps:$4 sm:$0xff]  }
  0x39   :  { %1137 = vmatprep.subr.bf16.mxu0 %v1621_v59  ;;  %v1714_v59 = vld [vmem:[%s2299_s1 + $0x3c4] ss:$8 sps:$4 sm:$0xff]  }
  0x3b   :  { %1032 = vmatpush1.bf16.msra.mxu1 %v1623_v60  ;;  %v1709_v60 = vld [vmem:[%s2299_s1 + $0x1c0] ss:$8 sps:$4 sm:$0xff]  }
  0x3c   :  { %1138 = vmatpush1.bf16.msra.mxu0 %v1624_v61  ;;  %1033 = vmatprep.subr.bf16.mxu1 %v1625_v62  ;;  %v1712_v61 = vld [vmem:[%s2299_s1 + $0x3c0] ss:$8 sps:$4 sm:$0xff]   ;;  %v1717_v62 = vld [vmem:[%s2299_s1 + $0x1d4] ss:$8 sps:$4 sm:$0xff]  }
  0x3d   :  { %1139 = vmatprep.subr.bf16.mxu0 %v1627_v63  ;;  %v1720_v63 = vld [vmem:[%s2299_s1 + $0x3d4] ss:$8 sps:$4 sm:$0xff]  }
  0x3f   :  { %1034 = vmatpush1.bf16.msra.mxu1 %v1629_v0  ;;  %v1715_v0 = vld [vmem:[%s2299_s1 + $0x1d0] ss:$8 sps:$4 sm:$0xff]  }
  0x40   :  { %1140 = vmatpush1.bf16.msra.mxu0 %v1630_v1  ;;  %1056 = vmatprep.subr.bf16.mxu1 %v1636_v2  ;;  %v1718_v1 = vld [vmem:[%s2299_s1 + $0x3d0] ss:$8 sps:$4 sm:$0xff]   ;;  %v1728_v2 = vld [vmem:[%s2299_s1 + $0x1e4] ss:$8 sps:$4 sm:$0xff]  }
  0x41   :  { %1162 = vmatprep.subr.bf16.mxu0 %v1642_v3  ;;  %v1732_v3 = vld [vmem:[%s2299_s1 + $0x3e4] ss:$8 sps:$4 sm:$0xff]  }
  0x42   :  { %1036 = vmatmul.mubr.bf16.vlgmr.msra.gmra.mrb[0].mxu1 %v1631_v4  ;;  %v1726_v4 = vld [vmem:[%s2299_s1 + $0x1e0] ss:$8 sps:$4 sm:$0xff]  }
  0x43   :  { %1142 = vmatmul.mubr.bf16.vlgmr.msra.gmra.mrb[0].mxu0 %v1637_v6  ;;  %1057 = vmatpush1.bf16.msra.mxu1 %v1634_v5  ;;  %v1730_v5 = vld [vmem:[%s2299_s1 + $0x3e0] ss:$8 sps:$4 sm:$0xff]   ;;  %v1735_v6 = vld [vmem:[%s2299_s1 + $0x1f4] ss:$8 sps:$4 sm:$0xff]  }
  0x44   :  { %1163 = vmatpush1.bf16.msra.mxu0 %v1640_v7  ;;  %1058 = vmatprep.subr.bf16.mxu1 %v1645_v8  ;;  %v1738_v7 = vld [vmem:[%s2299_s1 + $0x3f4] ss:$8 sps:$4 sm:$0xff]   ;;  %v1733_v8 = vld [vmem:[%s2299_s1 + $0x1f0] ss:$8 sps:$4 sm:$0xff]  }
  0x45   :  { %1164 = vmatprep.subr.bf16.mxu0 %v1648_v9  ;;  %1045 = vmatprep.mubr.bf16.mxu1 %v1721_v29  ;;  %v1736_v9 = vld [vmem:[%s2299_s1 + $0x3f0] ss:$8 sps:$4 sm:$0xff]   ;;  %v1771_v29 = vld [vmem:[%s2299_s1 + $0x464] ss:$8 sps:$4 sm:$0xff]  }
  0x46   :  { %1151 = vmatprep.mubr.bf16.mxu0 %v1723_v30  ;;  %v1769_v30 = vld [vmem:[%s2299_s1 + $0x460] ss:$8 sps:$4 sm:$0xff]  }
  0x47   :  { %1059 = vmatpush1.bf16.msra.mxu1 %v1643_v10  ;;  %v1747_v10 = vld [vmem:[%s2299_s1 + $0x404] ss:$8 sps:$4 sm:$0xff]  }
  0x48   :  { %1165 = vmatpush1.bf16.msra.mxu0 %v1646_v11  ;;  %1060 = vmatprep.subr.bf16.mxu1 %v1651_v12  ;;  %v1739_v11 = vld [vmem:[%s2300_s0 + $0x8] ss:$36 sps:$4 sm:$0xff]   ;;  %v1742_v12 = vld [vmem:[%s2300_s0 + $0x18] ss:$36 sps:$4 sm:$0xff]  }
  0x49   :  { %1166 = vmatprep.subr.bf16.mxu0 %v1654_v13  ;;  %v1745_v13 = vld [vmem:[%s2299_s1 + $0x400] ss:$8 sps:$4 sm:$0xff]  }
  0x4a   :  { %1046 = vmatmul.mubr.bf16.gmra.mrb[4].mxu1 %v1725_v31  ;;  %v1774_v31 = vld [vmem:[%s2299_s1 + $0x474] ss:$8 sps:$4 sm:$0xff]  }
  0x4b   :  { %1061 = vmatpush1.bf16.msra.mxu1 %v1649_v14  ;;  %1152 = vmatmul.mubr.bf16.gmra.mrb[4].mxu0 %v1729_v33  ;;  %v1750_v14 = vld [vmem:[%s2299_s1 + $0x414] ss:$8 sps:$4 sm:$0xff]   ;;  %v1775_v33 = vld [vmem:[%s2300_s0 + $0x20] ss:$36 sps:$4 sm:$0xff]  }
  0x4c   :  { %1167 = vmatpush1.bf16.msra.mxu0 %v1652_v15  ;;  %1062 = vmatprep.subr.bf16.mxu1 %v1657_v16  ;;  %v1751_v15 = vld [vmem:[%s2300_s0 + $0x54] ss:$36 sps:$4 sm:$0xff]   ;;  %v1753_v16 = vld [vmem:[%s2300_s0 + $0x64] ss:$36 sps:$4 sm:$0xff]  }
  0x4d   :  { %1168 = vmatprep.subr.bf16.mxu0 %v1660_v17  ;;  %1088 = vmatprep.mubr.bf16.mxu1 %v1741_v41  ;;  %v1748_v17 = vld [vmem:[%s2299_s1 + $0x410] ss:$8 sps:$4 sm:$0xff]  }
  0x4e   :  { %1194 = vmatprep.mubr.bf16.mxu0 %v1744_v43 }
  0x4f   :  { %1063 = vmatpush1.bf16.msra.mxu1 %v1655_v18  ;;  %v1759_v18 = vld [vmem:[%s2299_s1 + $0x424] ss:$8 sps:$4 sm:$0xff]  }
  0x50   :  { %1169 = vmatpush1.bf16.msra.mxu0 %v1658_v19  ;;  %1064 = vmatprep.subr.bf16.mxu1 %v1663_v20  ;;  %v1755_v19 = vld [vmem:[%s2300_s0 + $0x50] ss:$36 sps:$4 sm:$0xff]   ;;  %v1756_v20 = vld [vmem:[%s2300_s0 + $0x60] ss:$36 sps:$4 sm:$0xff]  }
  0x51   :  { %1170 = vmatprep.subr.bf16.mxu0 %v1666_v21  ;;  %v1757_v21 = vld [vmem:[%s2299_s1 + $0x420] ss:$8 sps:$4 sm:$0xff]  }
  0x53   :  { %1065 = vmatpush1.bf16.msra.mxu1 %v1661_v22  ;;  %v1762_v22 = vld [vmem:[%s2299_s1 + $0x434] ss:$8 sps:$4 sm:$0xff]  }
  0x54   :  { %1171 = vmatpush1.bf16.msra.mxu0 %v1664_v23  ;;  %1066 = vmatprep.subr.bf16.mxu1 %v1669_v24  ;;  %v1760_v23 = vld [vmem:[%s2299_s1 + $0x430] ss:$8 sps:$4 sm:$0xff]   ;;  %v1765_v24 = vld [vmem:[%s2299_s1 + $0x444] ss:$8 sps:$4 sm:$0xff]  }
  0x55   :  { %1172 = vmatprep.subr.bf16.mxu0 %v1672_v25  ;;  %v1777_v25 = vmov 0  }
  0x57   :  { %1067 = vmatpush1.bf16.msra.mxu1 %v1667_v26  ;;  %v1763_v26 = vld [vmem:[%s2299_s1 + $0x440] ss:$8 sps:$4 sm:$0xff]  }
  0x58   :  { %1173 = vmatpush1.bf16.msra.mxu0 %v1670_v27  ;;  %1068 = vmatprep.subr.bf16.mxu1 %v1675_v28  ;;  %v1768_v27 = vld [vmem:[%s2299_s1 + $0x454] ss:$8 sps:$4 sm:$0xff]   ;;  %v1766_v28 = vld [vmem:[%s2299_s1 + $0x450] ss:$8 sps:$4 sm:$0xff]  }
  0x59   :  { %1174 = vmatprep.subr.bf16.mxu0 %v1678_v32  ;;  %v1772_v32 = vld [vmem:[%s2299_s1 + $0x470] ss:$8 sps:$4 sm:$0xff]  }
  0x5b   :  { %1069 = vmatpush1.bf16.msra.mxu1 %v1673_v34  ;;  %v1776_v34 = vld [vmem:[%s2300_s0 + $0x68] ss:$36 sps:$4 sm:$0xff]  }
  0x5c   :  { %1175 = vmatpush1.bf16.msra.mxu0 %v1676_v35  ;;  %1070 = vmatprep.subr.bf16.mxu1 %v1681_v36  ;;  %v181_v35 = vlaneseq }
  0x5d   :  { %1176 = vmatprep.subr.bf16.mxu0 %v1684_v37 }
  0x5e   :  { %v182_v36 = vshrl.u32 %v181_v35, 7 }
  0x5f   :  { %1071 = vmatpush1.bf16.msra.mxu1 %v1679_v38 }
  0x60   :  { %1177 = vmatpush1.bf16.msra.mxu0 %v1682_v39  ;;  %1072 = vmatprep.subr.bf16.mxu1 %v1687_v40  ;;  %v183_v40 = vsub.s32 0, %v182_v36  ;;  %v187_v43 = vsub.s32 1, %v182_v36 }
  0x61   :  { %1178 = vmatprep.subr.bf16.mxu0 %v1690_v42  ;;  %v179_v42 = vld [vmem:[%s2301_s2] sm:$0x3] }
  0x63   :  { %1073 = vmatpush1.bf16.msra.mxu1 %v1685_v44  ;;  %v184_v44 = vrot.slane %v179_v42, %v183_v40 }
  0x64   :  { %1179 = vmatpush1.bf16.msra.mxu0 %v1688_v45  ;;  %1074 = vmatprep.subr.bf16.mxu1 %v1693_v46  ;;  %v188_v45 = vrot.slane %v179_v42, %v187_v43 }
  0x65   :  { %1180 = vmatprep.subr.bf16.mxu0 %v1696_v47 }
  0x67   :  { %1075 = vmatpush1.bf16.msra.mxu1 %v1691_v48 }
  0x68   :  { %1181 = vmatpush1.bf16.msra.mxu0 %v1694_v49  ;;  %1076 = vmatprep.subr.bf16.mxu1 %v1699_v50 }
  0x69   :  { %1182 = vmatprep.subr.bf16.mxu0 %v1702_v51 }
  0x6b   :  { %1077 = vmatpush1.bf16.msra.mxu1 %v1697_v52 }
  0x6c   :  { %1183 = vmatpush1.bf16.msra.mxu0 %v1700_v53  ;;  %1078 = vmatprep.subr.bf16.mxu1 %v1705_v54 }
  0x6d   :  { %1184 = vmatprep.subr.bf16.mxu0 %v1708_v55 }
  0x6f   :  { %1079 = vmatpush1.bf16.msra.mxu1 %v1703_v56 }
  0x70   :  { %1185 = vmatpush1.bf16.msra.mxu0 %v1706_v57  ;;  %1080 = vmatprep.subr.bf16.mxu1 %v1711_v58 }
  0x71   :  { %1186 = vmatprep.subr.bf16.mxu0 %v1714_v59 }
  0x73   :  { %1081 = vmatpush1.bf16.msra.mxu1 %v1709_v60 }
  0x74   :  { %1187 = vmatpush1.bf16.msra.mxu0 %v1712_v61  ;;  %1082 = vmatprep.subr.bf16.mxu1 %v1717_v62 }
  0x75   :  { %1188 = vmatprep.subr.bf16.mxu0 %v1720_v63 }
  0x77   :  { %1083 = vmatpush1.bf16.msra.mxu1 %v1715_v0 }
  0x78   :  { %1189 = vmatpush1.bf16.msra.mxu0 %v1718_v1  ;;  %1084 = vmatprep.subr.bf16.mxu1 %v1728_v2 }
  0x79   :  { %1190 = vmatprep.subr.bf16.mxu0 %v1732_v3 }
  0x7b   :  { %1085 = vmatpush1.bf16.msra.mxu1 %v1726_v4 }
  0x7c   :  { %1191 = vmatpush1.bf16.msra.mxu0 %v1730_v5  ;;  %1086 = vmatprep.subr.bf16.mxu1 %v1735_v6 }
  0x7d   :  { %1192 = vmatprep.subr.bf16.mxu0 %v1738_v7 }
  0x7f   :  { %1087 = vmatpush1.bf16.msra.mxu1 %v1733_v8 }
  0x80   :  { %1193 = vmatpush1.bf16.msra.mxu0 %v1736_v9  ;;  %1478 = vmatprep.subr.bf16.mxu1 %v1747_v10 }
  0x81   :  { %1215 = vmatprep.subr.bf16.mxu0 %v1747_v10 }
  0x82   :  { %1089 = vmatmul.mubr.bf16.vlgmr.msra.gmra.mrb[0].mxu1 %v1739_v11 }
  0x83   :  { %1195 = vmatmul.mubr.bf16.vlgmr.msra.gmra.mrb[0].mxu0 %v1742_v12  ;;  %1486 = vmatpush1.bf16.msra.mxu1 %v1745_v13 }
  0x84   :  { %1216 = vmatpush1.bf16.msra.mxu0 %v1745_v13  ;;  %1479 = vmatprep.subr.bf16.mxu1 %v1750_v14 }
  0x85   :  { %1217 = vmatprep.subr.bf16.mxu0 %v1750_v14  ;;  %1098 = vmatprep.mubr.bf16.mxu1 %v1751_v15 }
  0x86   :  { %1204 = vmatprep.mubr.bf16.mxu0 %v1753_v16 }
  0x87   :  { %1487 = vmatpush1.bf16.msra.mxu1 %v1748_v17 }
  0x88   :  { %1218 = vmatpush1.bf16.msra.mxu0 %v1748_v17  ;;  %1480 = vmatprep.subr.bf16.mxu1 %v1759_v18 }
  0x89   :  { %1219 = vmatprep.subr.bf16.mxu0 %v1759_v18 }
  0x8a   :  { %1099 = vmatmul.mubr.bf16.gmra.mrb[4].mxu1 %v1755_v19 }
  0x8b   :  { %1205 = vmatmul.mubr.bf16.gmra.mrb[4].mxu0 %v1756_v20  ;;  %1488 = vmatpush1.bf16.msra.mxu1 %v1757_v21 }
  0x8c   :  { %1220 = vmatpush1.bf16.msra.mxu0 %v1757_v21  ;;  %1481 = vmatprep.subr.bf16.mxu1 %v1762_v22 }
  0x8d   :  { %1221 = vmatprep.subr.bf16.mxu0 %v1762_v22  ;;  %1247 = vmatprep.mubr.bf16.mxu0 %v1777_v25 }
  0x8e   :  { %1257 = vmatprep.mubr.bf16.mxu1 %v1777_v25 }
  0x8f   :  { %1489 = vmatpush1.bf16.msra.mxu1 %v1760_v23 }
  0x90   :  { %1222 = vmatpush1.bf16.msra.mxu0 %v1760_v23  ;;  %1482 = vmatprep.subr.bf16.mxu1 %v1765_v24 }
  0x91   :  { %1223 = vmatprep.subr.bf16.mxu0 %v1765_v24 }
  0x93   :  { %1490 = vmatpush1.bf16.msra.mxu1 %v1763_v26 }
  0x94   :  { %1224 = vmatpush1.bf16.msra.mxu0 %v1763_v26  ;;  %1483 = vmatprep.subr.bf16.mxu1 %v1768_v27 }
  0x95   :  { %1225 = vmatprep.subr.bf16.mxu0 %v1768_v27 }
  0x97   :  { %1491 = vmatpush1.bf16.msra.mxu1 %v1766_v28 }
  0x98   :  { %1226 = vmatpush1.bf16.msra.mxu0 %v1766_v28  ;;  %1484 = vmatprep.subr.bf16.mxu1 %v1771_v29 }
  0x99   :  { %1227 = vmatprep.subr.bf16.mxu0 %v1771_v29 }
  0x9b   :  { %1492 = vmatpush1.bf16.msra.mxu1 %v1769_v30 }
  0x9c   :  { %1228 = vmatpush1.bf16.msra.mxu0 %v1769_v30  ;;  %1485 = vmatprep.subr.bf16.mxu1 %v1774_v31 }
  0x9d   :  { %1229 = vmatprep.subr.bf16.mxu0 %v1774_v31 }
  0x9f   :  { %1493 = vmatpush1.bf16.msra.mxu1 %v1772_v32 }
  0xa0   :  { %1230 = vmatpush1.bf16.msra.mxu0 %v1772_v32 }
  0xa2   :  { %1258 = vmatmul.mubr.bf16.vlgmr.msra.gmra.mrb[8].mxu1 %v1776_v34 }
  0xa3   :  { %1248 = vmatmul.mubr.bf16.vlgmr.msra.gmra.mrb[0].mxu0 %v1775_v33 }
 0x155   :  { %v1090_v37 = vpop.f32.mrb[0].mxu1 }
 0x156   :  { %v1092_v38 = vpop.f32.mrb[1].mxu1  ;;  %v1494_v62 = vadd.f32 %v1090_v37, %v184_v44 }
 0x157   :  { %v1094_v39 = vpop.f32.mrb[2].mxu1  ;;  %v1496_v63 = vadd.f32 %v1092_v38, %v188_v45 }
 0x158   :  { %v1096_v41 = vpop.f32.mrb[3].mxu1  ;;  %v1498_v2 = vadd.f32 %v1094_v39, %v184_v44 }
 0x159   :  { %v1500_v7 = vadd.f32 %v1096_v41, %v188_v45 }
 0x15d   :  { %v1100_v46 = vpop.f32.mrb[4].mxu1 }
 0x15e   :  { %v1206_v47 = vpop.f32.mrb[4].mxu0  ;;  %v1502_v48 = vadd.f32 %v1100_v46, %v184_v44  ;;  %v1102_v49 = vpop.f32.mrb[5].mxu1 }
 0x15f   :  { %v1208_v50 = vpop.f32.mrb[5].mxu0  ;;  %v1505_v51 = vadd.f32 %v1102_v49, %v188_v45  ;;  %v1104_v52 = vpop.f32.mrb[6].mxu1 }
 0x160   :  { %v1210_v53 = vpop.f32.mrb[6].mxu0  ;;  %v1503_v54 = vadd.f32 %v1502_v48, %v1206_v47  ;;  %v1508_v55 = vadd.f32 %v1104_v52, %v184_v44  ;;  %v1106_v56 = vpop.f32.mrb[7].mxu1 }
 0x161   :  { %v1212_v57 = vpop.f32.mrb[7].mxu0  ;;  %v1506_v58 = vadd.f32 %v1505_v51, %v1208_v50  ;;  %v1511_v59 = vadd.f32 %v1106_v56, %v188_v45 }
 0x162   :  { %v1509_v60 = vadd.f32 %v1508_v55, %v1210_v53 }
 0x163   :  { %v1512_v61 = vadd.f32 %v1511_v59, %v1212_v57 }
 0x175   :  { %v1259_v1 = vpop.f32.mrb[8].mxu1 }
 0x176   :  { %v1249_v0 = vpop.f32.mrb[0].mxu0  ;;  %v1504_v4 = vadd.f32 %v1503_v54, %v1259_v1  ;;  %v1261_v6 = vpop.f32.mrb[9].mxu1 }
 0x177   :  { %v1495_v3 = vadd.f32 %v1494_v62, %v1249_v0  ;;  %v1251_v5 = vpop.f32.mrb[1].mxu0  ;;  %v1507_v9 = vadd.f32 %v1506_v58, %v1261_v6  ;;  %v1263_v11 = vpop.f32.mrb[10].mxu1 }
 0x178   :  { %v1497_v8 = vadd.f32 %v1496_v63, %v1251_v5  ;;  %v1253_v10 = vpop.f32.mrb[2].mxu0  ;;  %v1272_v13 = vmax.f32 %v1504_v4, 0.0  ;;  %v1510_v15 = vadd.f32 %v1509_v60, %v1263_v11  ;;  %v1265_v17 = vpop.f32.mrb[11].mxu1 }
 0x179   :  { %v1268_v12 = vmax.f32 %v1495_v3, 0.0  ;;  %v1499_v14 = vadd.f32 %v1498_v2, %v1253_v10  ;;  %v1255_v16 = vpop.f32.mrb[3].mxu0  ;;  %v1273_v19 = vmax.f32 %v1507_v9, 0.0  ;;  %v1513_v21 = vadd.f32 %v1512_v61, %v1265_v17 }
 0x17a   :  { %v1269_v18 = vmax.f32 %v1497_v8, 0.0  ;;  %v1501_v20 = vadd.f32 %v1500_v7, %v1255_v16  ;;  %v1274_v23 = vmax.f32 %v1510_v15, 0.0 }
 0x17b   :  { %v1270_v22 = vmax.f32 %v1499_v14, 0.0  ;;  %v1476_v25 = vpack.c.bf16 %v1273_v19, %v1272_v13  ;;  %v1275_v27 = vmax.f32 %v1513_v21, 0.0 }
 0x17c   :  { %v1474_v24 = vpack.c.bf16 %v1269_v18, %v1268_v12  ;;  %v1271_v26 = vmax.f32 %v1501_v20, 0.0 }
 0x17d   :  { %1302 = vst [vmem:[%s2302_s3 + $0x10] sm:$0xff] %v1476_v25  ;;  %v1477_v29 = vpack.c.bf16 %v1275_v27, %v1274_v23 }
 0x17e   :  { %1300 = vst [vmem:[%s2302_s3] sm:$0xff] %v1474_v24  ;;  %v1475_v28 = vpack.c.bf16 %v1271_v26, %v1270_v22 }
 0x17f   :  { %1303 = vst [vmem:[%s2302_s3 + $0x18] sm:$0xff] %v1477_v29 }
 0x180   :  { %1301 = vst [vmem:[%s2302_s3 + $0x8] sm:$0xff] %v1475_v28 }

// kernel: unet_forward.11
= control target key start
LH: loop header
LB: loop body
LE: loop exit
PB: predicated region body
PF: predicated region fallthrough
CT: control target
= control target key end

     0   :  { %vm558_vm0 = vcmask 523264   ;;  %s1762_s1 = inlined_call_operand.vmem [shape: bf16[576,128], index: 1, kind: input, shape index: {}]   ;;  %s1763_s0 = inlined_call_operand.vmem [shape: bf16[128,576], index: 0, kind: input, shape index: {}]   ;;  %s1764_s2 = inlined_call_operand.vmem [shape: f32[1,128], index: 2, kind: input, shape index: {}]   ;;  %s1765_s3 = inlined_call_operand.vmem [shape: bf16[128,128], index: 3, kind: output, shape index: {}]  }
   0x1   :  { %v1310_v0 = vld [vmem:[%s1762_s1 + $0x40] sm:$0xff]   ;;  %v1314_v4 = vld [vmem:[%s1762_s1 + $0x48] sm:$0xff]   ;;  %v1318_v8 = vld [vmem:[%s1762_s1 + $0x50] sm:$0xff]  }
   0x2   :  { %v1311_v1 = vld [vmem:[%s1762_s1 + $0xc0] sm:$0xff]   ;;  %1138 = vmatprep.subr.bf16.mxu0 %v1310_v0  ;;  %v1315_v5 = vld [vmem:[%s1762_s1 + $0xc8] sm:$0xff]   ;;  %v1319_v9 = vld [vmem:[%s1762_s1 + $0xd0] sm:$0xff]  }
   0x3   :  { %v1312_v2 = vld [vmem:[%s1762_s1] sm:$0xff]   ;;  %1202 = vmatprep.subr.bf16.mxu1 %v1311_v1  ;;  %v1316_v6 = vld [vmem:[%s1762_s1 + $0x8] sm:$0xff]   ;;  %v1320_v10 = vld [vmem:[%s1762_s1 + $0x10] sm:$0xff]  }
   0x4   :  { %v1313_v3 = vld [vmem:[%s1762_s1 + $0x80] sm:$0xff]   ;;  %1139 = vmatpush3.bf16.msra.mxu0 %v1312_v2  ;;  %v1317_v7 = vld [vmem:[%s1762_s1 + $0x88] sm:$0xff]   ;;  %v1321_v11 = vld [vmem:[%s1762_s1 + $0x90] sm:$0xff]  }
   0x5   :  { %1203 = vmatpush3.bf16.msra.mxu1 %v1313_v3  ;;  %1140 = vmatprep.subr.bf16.mxu0 %v1314_v4  ;;  %v1322_v12 = vld [vmem:[%s1762_s1 + $0x58] sm:$0xff]   ;;  %v1326_v16 = vld [vmem:[%s1762_s1 + $0x60] sm:$0xff]   ;;  %v1330_v20 = vld [vmem:[%s1762_s1 + $0x68] sm:$0xff]  }
   0x6   :  { %1204 = vmatprep.subr.bf16.mxu1 %v1315_v5  ;;  %v1323_v13 = vld [vmem:[%s1762_s1 + $0xd8] sm:$0xff]   ;;  %v1327_v17 = vld [vmem:[%s1762_s1 + $0xe0] sm:$0xff]   ;;  %v1331_v21 = vld [vmem:[%s1762_s1 + $0xe8] sm:$0xff]  }
   0x7   :  { %v1324_v14 = vld [vmem:[%s1762_s1 + $0x18] sm:$0xff]   ;;  %v1328_v18 = vld [vmem:[%s1762_s1 + $0x20] sm:$0xff]   ;;  %v1332_v22 = vld [vmem:[%s1762_s1 + $0x28] sm:$0xff]  }
   0x8   :  { %1141 = vmatpush3.bf16.msra.mxu0 %v1316_v6  ;;  %v1325_v15 = vld [vmem:[%s1762_s1 + $0x98] sm:$0xff]   ;;  %v1329_v19 = vld [vmem:[%s1762_s1 + $0xa0] sm:$0xff]   ;;  %v1333_v23 = vld [vmem:[%s1762_s1 + $0xa8] sm:$0xff]  }
   0x9   :  { %1205 = vmatpush3.bf16.msra.mxu1 %v1317_v7  ;;  %1142 = vmatprep.subr.bf16.mxu0 %v1318_v8  ;;  %v1334_v24 = vld [vmem:[%s1762_s1 + $0x70] sm:$0xff]   ;;  %v1338_v28 = vld [vmem:[%s1762_s1 + $0x78] sm:$0xff]   ;;  %v1347_v35 = vld [vmem:[%s1763_s0 + $0xc] ss:$20 sps:$4 sm:$0xff]  }
   0xa   :  { %1206 = vmatprep.subr.bf16.mxu1 %v1319_v9  ;;  %v1335_v25 = vld [vmem:[%s1762_s1 + $0xf0] sm:$0xff]   ;;  %v1339_v29 = vld [vmem:[%s1762_s1 + $0xf8] sm:$0xff]   ;;  %v1348_v36 = vld [vmem:[%s1762_s1 + $0x100] sm:$0xff]   ;;  %712 = vmatprep.mubr.bf16.mxu1 %v1347_v35 }
   0xb   :  { %v1336_v26 = vld [vmem:[%s1762_s1 + $0x30] sm:$0xff]   ;;  %v1340_v30 = vld [vmem:[%s1762_s1 + $0x38] sm:$0xff]   ;;  %v1349_v37 = vld [vmem:[%s1763_s0 + $0x2c] ss:$20 sps:$4 sm:$0xff]  }
   0xc   :  { %1143 = vmatpush3.bf16.msra.mxu0 %v1320_v10  ;;  %v1337_v27 = vld [vmem:[%s1762_s1 + $0xb0] sm:$0xff]   ;;  %v1341_v31 = vld [vmem:[%s1762_s1 + $0xb8] sm:$0xff]   ;;  %v1361_v42 = vld [vmem:[%s1762_s1 + $0x108] sm:$0xff]  }
   0xd   :  { %1207 = vmatpush3.bf16.msra.mxu1 %v1321_v11  ;;  %1144 = vmatprep.subr.bf16.mxu0 %v1322_v12  ;;  %v1342_v32 = vld [vmem:[%s1763_s0] ss:$20 sps:$4 sm:$0xff]   ;;  %v1344_v33 = vld [vmem:[%s1763_s0 + $0x4] ss:$20 sps:$4 sm:$0xff]   ;;  %v1345_v34 = vld [vmem:[%s1763_s0 + $0x8] ss:$20 sps:$4 sm:$0xff]  }
   0xe   :  { %1208 = vmatprep.subr.bf16.mxu1 %v1323_v13  ;;  %615 = vmatprep.mubr.bf16.mxu0 %v1344_v33  ;;  %v1351_v38 = vld [vmem:[%s1763_s0 + $0x34] ss:$20 sps:$4 sm:$0xff]   ;;  %v1354_v40 = vld [vmem:[%s1763_s0 + $0x30] ss:$20 sps:$4 sm:$0xff]   ;;  %v1360_v45 = vld [vmem:[%s1763_s0 + $0x58] ss:$20 sps:$4 sm:$0xff]  }
   0xf   :  { %v1353_v39 = vld [vmem:[%s1763_s0 + $0x28] ss:$20 sps:$4 sm:$0xff]   ;;  %v1359_v44 = vld [vmem:[%s1763_s0 + $0x50] ss:$20 sps:$4 sm:$0xff]   ;;  %v1366_v50 = vld [vmem:[%s1763_s0 + $0x78] ss:$20 sps:$4 sm:$0xff]  }
  0x10   :  { %1145 = vmatpush3.bf16.msra.mxu0 %v1324_v14  ;;  %v1355_v41 = vld [vmem:[%s1763_s0 + $0x54] ss:$20 sps:$4 sm:$0xff]   ;;  %v1357_v43 = vld [vmem:[%s1763_s0 + $0x5c] ss:$20 sps:$4 sm:$0xff]   ;;  %v1364_v48 = vld [vmem:[%s1763_s0 + $0x84] ss:$20 sps:$4 sm:$0xff]  }
  0x11   :  { %1209 = vmatpush3.bf16.msra.mxu1 %v1325_v15  ;;  %1146 = vmatprep.subr.bf16.mxu0 %v1326_v16  ;;  %v1374_v46 = vld [vmem:[%s1762_s1 + $0x110] sm:$0xff]   ;;  %v1387_v49 = vld [vmem:[%s1762_s1 + $0x118] sm:$0xff]   ;;  %v1370_v53 = vld [vmem:[%s1763_s0 + $0xac] ss:$20 sps:$4 sm:$0xff]  }
  0x12   :  { %1210 = vmatprep.subr.bf16.mxu1 %v1327_v17  ;;  %v1362_v47 = vld [vmem:[%s1763_s0 + $0x7c] ss:$20 sps:$4 sm:$0xff]   ;;  %v1367_v51 = vld [vmem:[%s1763_s0 + $0x80] ss:$20 sps:$4 sm:$0xff]   ;;  %v1368_v52 = vld [vmem:[%s1763_s0 + $0xa4] ss:$20 sps:$4 sm:$0xff]  }
  0x13   :  { %v1372_v54 = vld [vmem:[%s1763_s0 + $0xa0] ss:$20 sps:$4 sm:$0xff]   ;;  %v1373_v55 = vld [vmem:[%s1763_s0 + $0xa8] ss:$20 sps:$4 sm:$0xff]   ;;  %v1380_v59 = vld [vmem:[%s1763_s0 + $0xd0] ss:$20 sps:$4 sm:$0xff]  }
  0x14   :  { %1147 = vmatpush3.bf16.msra.mxu0 %v1328_v18  ;;  %v1375_v56 = vld [vmem:[%s1763_s0 + $0xcc] ss:$20 sps:$4 sm:$0xff]   ;;  %v1377_v57 = vld [vmem:[%s1763_s0 + $0xd4] ss:$20 sps:$4 sm:$0xff]   ;;  %v1383_v61 = vld [vmem:[%s1763_s0 + $0xfc] ss:$20 sps:$4 sm:$0xff]  }
  0x15   :  { %1211 = vmatpush3.bf16.msra.mxu1 %v1329_v19  ;;  %1148 = vmatprep.subr.bf16.mxu0 %v1330_v20  ;;  %v1379_v58 = vld [vmem:[%s1763_s0 + $0xc8] ss:$20 sps:$4 sm:$0xff]   ;;  %v1385_v62 = vld [vmem:[%s1763_s0 + $0xf0] ss:$20 sps:$4 sm:$0xff]   ;;  %v1386_v63 = vld [vmem:[%s1763_s0 + $0xf8] ss:$20 sps:$4 sm:$0xff]  }
  0x16   :  { %1212 = vmatprep.subr.bf16.mxu1 %v1331_v21  ;;  %v1381_v60 = vld [vmem:[%s1763_s0 + $0xf4] ss:$20 sps:$4 sm:$0xff]   ;;  %v1388_v0 = vld [vmem:[%s1763_s0 + $0x11c] ss:$20 sps:$4 sm:$0xff]   ;;  %v1390_v1 = vld [vmem:[%s1763_s0 + $0x124] ss:$20 sps:$4 sm:$0xff]  }
  0x17   :  { %v1392_v2 = vld [vmem:[%s1763_s0 + $0x118] ss:$20 sps:$4 sm:$0xff]   ;;  %v1393_v3 = vld [vmem:[%s1763_s0 + $0x120] ss:$20 sps:$4 sm:$0xff]   ;;  %v1394_v4 = vld [vmem:[%s1763_s0 + $0x10] ss:$20 sps:$4 sm:$0xff]  }
  0x18   :  { %1149 = vmatpush3.bf16.msra.mxu0 %v1332_v22  ;;  %v1395_v5 = vld [vmem:[%s1763_s0 + $0xb0] ss:$20 sps:$4 sm:$0xff]   ;;  %v1396_v6 = vld [vmem:[%s1763_s0 + $0x38] ss:$20 sps:$4 sm:$0xff]   ;;  %v1398_v8 = vld [vmem:[%s1763_s0 + $0x60] ss:$20 sps:$4 sm:$0xff]  }
  0x19   :  { %1213 = vmatpush3.bf16.msra.mxu1 %v1333_v23  ;;  %1150 = vmatprep.subr.bf16.mxu0 %v1334_v24  ;;  %v1397_v7 = vld [vmem:[%s1763_s0 + $0xd8] ss:$20 sps:$4 sm:$0xff]   ;;  %v1399_v9 = vld [vmem:[%s1763_s0 + $0x100] ss:$20 sps:$4 sm:$0xff]   ;;  %v1400_v10 = vld [vmem:[%s1763_s0 + $0x88] ss:$20 sps:$4 sm:$0xff]  }
  0x1a   :  { %1214 = vmatprep.subr.bf16.mxu1 %v1335_v25  ;;  %v1401_v11 = vld [vmem:[%s1763_s0 + $0x128] ss:$20 sps:$4 sm:$0xff]   ;;  %v1693_v14 = vld [vmem:[%s1764_s2] ss:$0 sm:$0xff] }
  0x1c   :  { %1151 = vmatpush3.bf16.msra.mxu0 %v1336_v26 }
  0x1d   :  { %1215 = vmatpush3.bf16.msra.mxu1 %v1337_v27  ;;  %1152 = vmatprep.subr.bf16.mxu0 %v1338_v28 }
  0x1e   :  { %1216 = vmatprep.subr.bf16.mxu1 %v1339_v29 }
  0x20   :  { %1153 = vmatpush3.bf16.msra.mxu0 %v1340_v30 }
  0x21   :  { %1217 = vmatpush3.bf16.msra.mxu1 %v1341_v31  ;;  %1278 = vmatprep.subr.bf16.mxu0 %v1348_v36 }
  0x22   :  { %1302 = vmatprep.subr.bf16.mxu1 %v1348_v36 }
  0x23   :  { %616 = vmatmul.mubr.bf16.vlgmr.msra.gmra.mrb[0].mxu0 %v1342_v32 }
  0x24   :  { %713 = vmatmul.mubr.bf16.vlgmr.msra.gmra.mrb[0].mxu1 %v1345_v34  ;;  %1279 = vmatpush3.bf16.msra.mxu0 %v1348_v36 }
  0x25   :  { %1306 = vmatpush3.bf16.msra.mxu1 %v1348_v36  ;;  %623 = vmatprep.mubr.bf16.mxu0 %v1349_v37 }
  0x26   :  { %720 = vmatprep.mubr.bf16.mxu1 %v1351_v38  ;;  %1280 = vmatprep.subr.bf16.mxu0 %v1361_v42 }
  0x27   :  { %1303 = vmatprep.subr.bf16.mxu1 %v1361_v42 }
  0x28   :  { %1281 = vmatpush3.bf16.msra.mxu0 %v1361_v42 }
  0x29   :  { %1307 = vmatpush3.bf16.msra.mxu1 %v1361_v42  ;;  %1282 = vmatprep.subr.bf16.mxu0 %v1374_v46 }
  0x2a   :  { %1304 = vmatprep.subr.bf16.mxu1 %v1374_v46 }
  0x2b   :  { %624 = vmatmul.mubr.bf16.gmra.mrb[4].mxu0 %v1353_v39 }
  0x2c   :  { %721 = vmatmul.mubr.bf16.gmra.mrb[4].mxu1 %v1354_v40  ;;  %631 = vmatprep.mubr.bf16.mxu0 %v1355_v41 }
  0x2d   :  { %728 = vmatprep.mubr.bf16.mxu1 %v1357_v43  ;;  %1283 = vmatpush3.bf16.msra.mxu0 %v1374_v46 }
  0x2e   :  { %1308 = vmatpush3.bf16.msra.mxu1 %v1374_v46  ;;  %1284 = vmatprep.subr.bf16.mxu0 %v1387_v49 }
  0x2f   :  { %1305 = vmatprep.subr.bf16.mxu1 %v1387_v49 }
  0x31   :  { %1285 = vmatpush3.bf16.msra.mxu0 %v1387_v49 }
  0x32   :  { %1309 = vmatpush3.bf16.msra.mxu1 %v1387_v49 }
  0x33   :  { %632 = vmatmul.mubr.bf16.gmra.mrb[8].mxu0 %v1359_v44 }
  0x34   :  { %729 = vmatmul.mubr.bf16.gmra.mrb[8].mxu1 %v1360_v45  ;;  %639 = vmatprep.mubr.bf16.mxu0 %v1362_v47 }
  0x35   :  { %736 = vmatprep.mubr.bf16.mxu1 %v1364_v48 }
  0x3b   :  { %640 = vmatmul.mubr.bf16.gmra.mrb[12].mxu0 %v1366_v50 }
  0x3c   :  { %737 = vmatmul.mubr.bf16.gmra.mrb[12].mxu1 %v1367_v51  ;;  %647 = vmatprep.mubr.bf16.mxu0 %v1368_v52 }
  0x3d   :  { %744 = vmatprep.mubr.bf16.mxu1 %v1370_v53 }
  0x43   :  { %648 = vmatmul.mubr.bf16.gmra.mrb[16].mxu0 %v1372_v54 }
  0x44   :  { %745 = vmatmul.mubr.bf16.gmra.mrb[16].mxu1 %v1373_v55  ;;  %655 = vmatprep.mubr.bf16.mxu0 %v1375_v56 }
  0x45   :  { %752 = vmatprep.mubr.bf16.mxu1 %v1377_v57 }
  0x4b   :  { %656 = vmatmul.mubr.bf16.gmra.mrb[20].mxu0 %v1379_v58 }
  0x4c   :  { %753 = vmatmul.mubr.bf16.gmra.mrb[20].mxu1 %v1380_v59  ;;  %663 = vmatprep.mubr.bf16.mxu0 %v1381_v60 }
  0x4d   :  { %760 = vmatprep.mubr.bf16.mxu1 %v1383_v61 }
  0x53   :  { %664 = vmatmul.mubr.bf16.gmra.mrb[24].mxu0 %v1385_v62 }
  0x54   :  { %761 = vmatmul.mubr.bf16.gmra.mrb[24].mxu1 %v1386_v63  ;;  %671 = vmatprep.mubr.bf16.mxu0 %v1388_v0 }
  0x55   :  { %768 = vmatprep.mubr.bf16.mxu1 %v1390_v1 }
  0x5b   :  { %672 = vmatmul.mubr.bf16.gmra.mrb[28].mxu0 %v1392_v2 }
  0x5c   :  { %769 = vmatmul.mubr.bf16.gmra.mrb[28].mxu1 %v1393_v3  ;;  %1286 = vmatprep.mubr.msk.bf16.mxu0 %vm558_vm0, %v1394_v4 }
  0x5d   :  { %1294 = vmatprep.mubr.msk.bf16.mxu1 %vm558_vm0, %v1395_v5 }
  0x63   :  { %1287 = vmatmul.mubr.msk.bf16.vlgmr.msra.gmra.mrb[32].mxu0 %vm558_vm0, %v1396_v6 }
  0x64   :  { %1295 = vmatmul.mubr.msk.bf16.vlgmr.msra.gmra.mrb[32].mxu1 %vm558_vm0, %v1397_v7  ;;  %1290 = vmatprep.mubr.msk.bf16.mxu0 %vm558_vm0, %v1398_v8 }
  0x65   :  { %1298 = vmatprep.mubr.msk.bf16.mxu1 %vm558_vm0, %v1399_v9 }
  0x6b   :  { %1291 = vmatmul.mubr.msk.bf16.gmra.mrb[36].mxu0 %vm558_vm0, %v1400_v10 }
  0x6c   :  { %1299 = vmatmul.mubr.msk.bf16.gmra.mrb[36].mxu1 %vm558_vm0, %v1401_v11 }
  0xf6   :  { %v1154_v12 = vpop.f32.mrb[0].mxu0 }
  0xf7   :  { %v1218_v13 = vpop.f32.mrb[0].mxu1  ;;  %v1155_v15 = vpop.f32.mrb[1].mxu0 }
  0xf8   :  { %v1156_v16 = vadd.f32 %v1155_v15, %v1154_v12  ;;  %v1219_v17 = vpop.f32.mrb[1].mxu1  ;;  %v1157_v18 = vpop.f32.mrb[2].mxu0 }
  0xf9   :  { %v1220_v19 = vadd.f32 %v1219_v17, %v1218_v13  ;;  %v1221_v20 = vpop.f32.mrb[2].mxu1  ;;  %v1158_v21 = vpop.f32.mrb[3].mxu0 }
  0xfa   :  { %v618_v22 = vadd.f32 %v1156_v16, %v1693_v14  ;;  %v1159_v23 = vadd.f32 %v1158_v21, %v1157_v18  ;;  %v1222_v24 = vpop.f32.mrb[3].mxu1 }
  0xfb   :  { %v1223_v25 = vadd.f32 %v1222_v24, %v1221_v20 }
  0xfc   :  { %v621_v26 = vadd.f32 %v1159_v23, %v1693_v14  ;;  %v1697_v27 = vadd.f32 %v1220_v19, %v618_v22 }
  0xfe   :  { %v1160_v28 = vpop.f32.mrb[4].mxu0  ;;  %v1699_v29 = vadd.f32 %v1223_v25, %v621_v26 }
  0xff   :  { %v1224_v30 = vpop.f32.mrb[4].mxu1  ;;  %v1161_v31 = vpop.f32.mrb[5].mxu0 }
 0x100   :  { %v1162_v32 = vadd.f32 %v1161_v31, %v1160_v28  ;;  %v1225_v33 = vpop.f32.mrb[5].mxu1  ;;  %v1163_v34 = vpop.f32.mrb[6].mxu0 }
 0x101   :  { %v1226_v35 = vadd.f32 %v1225_v33, %v1224_v30  ;;  %v1227_v36 = vpop.f32.mrb[6].mxu1  ;;  %v1164_v37 = vpop.f32.mrb[7].mxu0 }
 0x102   :  { %v626_v38 = vadd.f32 %v1162_v32, %v1693_v14  ;;  %v1165_v39 = vadd.f32 %v1164_v37, %v1163_v34  ;;  %v1228_v40 = vpop.f32.mrb[7].mxu1 }
 0x103   :  { %v1229_v41 = vadd.f32 %v1228_v40, %v1227_v36 }
 0x104   :  { %v629_v42 = vadd.f32 %v1165_v39, %v1693_v14  ;;  %v1703_v43 = vadd.f32 %v1226_v35, %v626_v38 }
 0x106   :  { %v1166_v44 = vpop.f32.mrb[8].mxu0  ;;  %v1705_v45 = vadd.f32 %v1229_v41, %v629_v42 }
 0x107   :  { %v1230_v46 = vpop.f32.mrb[8].mxu1  ;;  %v1167_v47 = vpop.f32.mrb[9].mxu0 }
 0x108   :  { %v1168_v48 = vadd.f32 %v1167_v47, %v1166_v44  ;;  %v1231_v49 = vpop.f32.mrb[9].mxu1  ;;  %v1169_v50 = vpop.f32.mrb[10].mxu0 }
 0x109   :  { %v1232_v51 = vadd.f32 %v1231_v49, %v1230_v46  ;;  %v1233_v52 = vpop.f32.mrb[10].mxu1  ;;  %v1170_v53 = vpop.f32.mrb[11].mxu0 }
 0x10a   :  { %v634_v54 = vadd.f32 %v1168_v48, %v1693_v14  ;;  %v1171_v55 = vadd.f32 %v1170_v53, %v1169_v50  ;;  %v1234_v56 = vpop.f32.mrb[11].mxu1 }
 0x10b   :  { %v1235_v57 = vadd.f32 %v1234_v56, %v1233_v52 }
 0x10c   :  { %v637_v58 = vadd.f32 %v1171_v55, %v1693_v14  ;;  %v1709_v59 = vadd.f32 %v1232_v51, %v634_v54 }
 0x10e   :  { %v1172_v60 = vpop.f32.mrb[12].mxu0  ;;  %v1711_v61 = vadd.f32 %v1235_v57, %v637_v58 }
 0x10f   :  { %v1236_v62 = vpop.f32.mrb[12].mxu1  ;;  %v1173_v63 = vpop.f32.mrb[13].mxu0 }
 0x110   :  { %v1174_v0 = vadd.f32 %v1173_v63, %v1172_v60  ;;  %v1237_v1 = vpop.f32.mrb[13].mxu1  ;;  %v1175_v2 = vpop.f32.mrb[14].mxu0 }
 0x111   :  { %v1238_v3 = vadd.f32 %v1237_v1, %v1236_v62  ;;  %v1239_v4 = vpop.f32.mrb[14].mxu1  ;;  %v1176_v5 = vpop.f32.mrb[15].mxu0 }
 0x112   :  { %v642_v6 = vadd.f32 %v1174_v0, %v1693_v14  ;;  %v1177_v7 = vadd.f32 %v1176_v5, %v1175_v2  ;;  %v1240_v8 = vpop.f32.mrb[15].mxu1 }
 0x113   :  { %v1241_v9 = vadd.f32 %v1240_v8, %v1239_v4 }
 0x114   :  { %v645_v10 = vadd.f32 %v1177_v7, %v1693_v14  ;;  %v1715_v11 = vadd.f32 %v1238_v3, %v642_v6 }
 0x116   :  { %v1178_v12 = vpop.f32.mrb[16].mxu0  ;;  %v1717_v13 = vadd.f32 %v1241_v9, %v645_v10 }
 0x117   :  { %v1242_v15 = vpop.f32.mrb[16].mxu1  ;;  %v1179_v16 = vpop.f32.mrb[17].mxu0 }
 0x118   :  { %v1180_v17 = vadd.f32 %v1179_v16, %v1178_v12  ;;  %v1243_v18 = vpop.f32.mrb[17].mxu1  ;;  %v1181_v19 = vpop.f32.mrb[18].mxu0 }
 0x119   :  { %v1244_v20 = vadd.f32 %v1243_v18, %v1242_v15  ;;  %v1245_v21 = vpop.f32.mrb[18].mxu1  ;;  %v1182_v22 = vpop.f32.mrb[19].mxu0 }
 0x11a   :  { %v650_v23 = vadd.f32 %v1180_v17, %v1693_v14  ;;  %v1183_v24 = vadd.f32 %v1182_v22, %v1181_v19  ;;  %v1246_v25 = vpop.f32.mrb[19].mxu1 }
 0x11b   :  { %v1247_v26 = vadd.f32 %v1246_v25, %v1245_v21 }
 0x11c   :  { %v653_v28 = vadd.f32 %v1183_v24, %v1693_v14  ;;  %v747_v30 = vadd.f32 %v1244_v20, %v650_v23 }
 0x11e   :  { %v1184_v31 = vpop.f32.mrb[20].mxu0  ;;  %v1721_v32 = vadd.f32 %v1247_v26, %v653_v28 }
 0x11f   :  { %v1248_v33 = vpop.f32.mrb[20].mxu1  ;;  %v1185_v34 = vpop.f32.mrb[21].mxu0 }
 0x120   :  { %v1186_v35 = vadd.f32 %v1185_v34, %v1184_v31  ;;  %v1249_v36 = vpop.f32.mrb[21].mxu1  ;;  %v1187_v37 = vpop.f32.mrb[22].mxu0 }
 0x121   :  { %v1250_v38 = vadd.f32 %v1249_v36, %v1248_v33  ;;  %v1251_v39 = vpop.f32.mrb[22].mxu1  ;;  %v1188_v40 = vpop.f32.mrb[23].mxu0 }
 0x122   :  { %v658_v41 = vadd.f32 %v1186_v35, %v1693_v14  ;;  %v1189_v42 = vadd.f32 %v1188_v40, %v1187_v37  ;;  %v1252_v44 = vpop.f32.mrb[23].mxu1 }
 0x123   :  { %v1253_v46 = vadd.f32 %v1252_v44, %v1251_v39 }
 0x124   :  { %v661_v47 = vadd.f32 %v1189_v42, %v1693_v14  ;;  %v755_v48 = vadd.f32 %v1250_v38, %v658_v41 }
 0x126   :  { %v1190_v49 = vpop.f32.mrb[24].mxu0  ;;  %v758_v50 = vadd.f32 %v1253_v46, %v661_v47 }
 0x127   :  { %v1254_v51 = vpop.f32.mrb[24].mxu1  ;;  %v1191_v52 = vpop.f32.mrb[25].mxu0 }
 0x128   :  { %v1192_v53 = vadd.f32 %v1191_v52, %v1190_v49  ;;  %v1255_v54 = vpop.f32.mrb[25].mxu1  ;;  %v1193_v55 = vpop.f32.mrb[26].mxu0 }
 0x129   :  { %v1256_v56 = vadd.f32 %v1255_v54, %v1254_v51  ;;  %v1257_v57 = vpop.f32.mrb[26].mxu1  ;;  %v1194_v58 = vpop.f32.mrb[27].mxu0 }
 0x12a   :  { %v666_v60 = vadd.f32 %v1192_v53, %v1693_v14  ;;  %v1195_v62 = vadd.f32 %v1194_v58, %v1193_v55  ;;  %v1258_v63 = vpop.f32.mrb[27].mxu1 }
 0x12b   :  { %v1259_v0 = vadd.f32 %v1258_v63, %v1257_v57 }
 0x12c   :  { %v669_v1 = vadd.f32 %v1195_v62, %v1693_v14  ;;  %v763_v2 = vadd.f32 %v1256_v56, %v666_v60 }
 0x12e   :  { %v1196_v3 = vpop.f32.mrb[28].mxu0  ;;  %v766_v4 = vadd.f32 %v1259_v0, %v669_v1 }
 0x12f   :  { %v1260_v5 = vpop.f32.mrb[28].mxu1  ;;  %v1197_v6 = vpop.f32.mrb[29].mxu0 }
 0x130   :  { %v1198_v7 = vadd.f32 %v1197_v6, %v1196_v3  ;;  %v1261_v8 = vpop.f32.mrb[29].mxu1  ;;  %v1199_v9 = vpop.f32.mrb[30].mxu0 }
 0x131   :  { %v1262_v10 = vadd.f32 %v1261_v8, %v1260_v5  ;;  %v1263_v12 = vpop.f32.mrb[30].mxu1  ;;  %v1200_v15 = vpop.f32.mrb[31].mxu0 }
 0x132   :  { %v674_v16 = vadd.f32 %v1198_v7, %v1693_v14  ;;  %v1201_v17 = vadd.f32 %v1200_v15, %v1199_v9  ;;  %v1264_v18 = vpop.f32.mrb[31].mxu1 }
 0x133   :  { %v1265_v19 = vadd.f32 %v1264_v18, %v1263_v12 }
 0x134   :  { %v677_v20 = vadd.f32 %v1201_v17, %v1693_v14  ;;  %v771_v21 = vadd.f32 %v1262_v10, %v674_v16 }
 0x136   :  { %v1288_v22 = vpop.f32.mrb[32].mxu0  ;;  %v774_v23 = vadd.f32 %v1265_v19, %v677_v20 }
 0x137   :  { %v820_v24 = vadd.f32 %v1288_v22, %v1703_v43  ;;  %v1296_v25 = vpop.f32.mrb[32].mxu1  ;;  %v811_v26 = vpop.f32.mrb[33].mxu0 }
 0x138   :  { %v852_v28 = vadd.f32 %v1296_v25, %v755_v48  ;;  %v812_v31 = vadd.f32 %v811_v26, %v1697_v27  ;;  %v843_v33 = vpop.f32.mrb[33].mxu1  ;;  %v1289_v34 = vpop.f32.mrb[34].mxu0 }
 0x139   :  { %1402 = vtanh.f32 %v820_v24  ;;  %v844_v35 = vadd.f32 %v843_v33, %v747_v30  ;;  %v823_v36 = vadd.f32 %v1289_v34, %v1705_v45  ;;  %v1297_v37 = vpop.f32.mrb[34].mxu1  ;;  %v814_v38 = vpop.f32.mrb[35].mxu0 }
 0x13a   :  { %1404 = vtanh.f32 %v852_v28  ;;  %v855_v14 = vadd.f32 %v1297_v37, %v758_v50  ;;  %v815_v39 = vadd.f32 %v814_v38, %v1699_v29  ;;  %v846_v40 = vpop.f32.mrb[35].mxu1 }
 0x13b   :  { %1406 = vtanh.f32 %v812_v31  ;;  %v847_v43 = vadd.f32 %v846_v40, %v1721_v32 }
 0x13c   :  { %1408 = vtanh.f32 %v844_v35 }
 0x13d   :  { %1410 = vtanh.f32 %v823_v36 }
 0x13e   :  { %1412 = vtanh.f32 %v855_v14  ;;  %v1292_v27 = vpop.f32.mrb[36].mxu0 }
 0x13f   :  { %1414 = vtanh.f32 %v815_v39  ;;  %v836_v41 = vadd.f32 %v1292_v27, %v1715_v11  ;;  %v1300_v30 = vpop.f32.mrb[36].mxu1  ;;  %v827_v42 = vpop.f32.mrb[37].mxu0 }
 0x140   :  { %1416 = vtanh.f32 %v847_v43  ;;  %v868_v45 = vadd.f32 %v1300_v30, %v771_v21  ;;  %v828_v44 = vadd.f32 %v827_v42, %v1709_v59  ;;  %v859_v46 = vpop.f32.mrb[37].mxu1  ;;  %v1293_v47 = vpop.f32.mrb[38].mxu0 }
 0x141   :  { %1418 = vtanh.f32 %v836_v41  ;;  %v860_v29 = vadd.f32 %v859_v46, %v763_v2  ;;  %v839_v48 = vadd.f32 %v1293_v47, %v1717_v13  ;;  %v1301_v32 = vpop.f32.mrb[38].mxu1  ;;  %v830_v49 = vpop.f32.mrb[39].mxu0 }
 0x142   :  { %1420 = vtanh.f32 %v868_v45  ;;  %v871_v50 = vadd.f32 %v1301_v32, %v774_v23  ;;  %v831_v51 = vadd.f32 %v830_v49, %v1711_v61  ;;  %v862_v52 = vpop.f32.mrb[39].mxu1 }
 0x143   :  { %v1403_v11 = vpop.eup %1402  ;;  %1422 = vtanh.f32 %v828_v44  ;;  %v863_v53 = vadd.f32 %v862_v52, %v766_v4 }
 0x144   :  { %v1405_v54 = vpop.eup %1404  ;;  %1424 = vtanh.f32 %v860_v29 }
 0x145   :  { %v1407_v55 = vpop.eup %1406  ;;  %1426 = vtanh.f32 %v839_v48 }
 0x146   :  { %v1409_v59 = vpop.eup %1408  ;;  %1428 = vtanh.f32 %v871_v50 }
 0x147   :  { %v1411_v56 = vpop.eup %1410  ;;  %1430 = vtanh.f32 %v831_v51 }
 0x148   :  { %v1413_v57 = vpop.eup %1412  ;;  %v1099_v13 = vpack.c.bf16 %v1411_v56, %v1403_v11  ;;  %1432 = vtanh.f32 %v863_v53 }
 0x149   :  { %v1415_v58 = vpop.eup %1414  ;;  %v1119_v60 = vpack.c.bf16 %v1413_v57, %v1405_v54 }
 0x14a   :  { %v1417_v62 = vpop.eup %1416  ;;  %1131 = vst [vmem:[%s1765_s3 + $0x8] sm:$0xff] %v1099_v13   ;;  %v1094_v61 = vpack.c.bf16 %v1415_v58, %v1407_v55 }
 0x14b   :  { %v1419_v63 = vpop.eup %1418  ;;  %1135 = vst [vmem:[%s1765_s3 + $0x28] sm:$0xff] %v1119_v60   ;;  %v1114_v0 = vpack.c.bf16 %v1417_v62, %v1409_v59 }
 0x14c   :  { %v1421_v1 = vpop.eup %1420  ;;  %1095 = vst [vmem:[%s1765_s3] sm:$0xff] %v1094_v61  }
 0x14d   :  { %v1423_v2 = vpop.eup %1422  ;;  %1134 = vst [vmem:[%s1765_s3 + $0x20] sm:$0xff] %v1114_v0  }
 0x14e   :  { %v1425_v3 = vpop.eup %1424 }
 0x14f   :  { %v1427_v4 = vpop.eup %1426 }
 0x150   :  { %v1429_v5 = vpop.eup %1428  ;;  %v1109_v6 = vpack.c.bf16 %v1427_v4, %v1419_v63 }
 0x151   :  { %v1431_v7 = vpop.eup %1430  ;;  %v1129_v8 = vpack.c.bf16 %v1429_v5, %v1421_v1 }
 0x152   :  { %v1433_v9 = vpop.eup %1432  ;;  %1133 = vst [vmem:[%s1765_s3 + $0x18] sm:$0xff] %v1109_v6   ;;  %v1104_v10 = vpack.c.bf16 %v1431_v7, %v1423_v2 }
 0x153   :  { %1137 = vst [vmem:[%s1765_s3 + $0x38] sm:$0xff] %v1129_v8   ;;  %v1124_v12 = vpack.c.bf16 %v1433_v9, %v1425_v3 }
 0x154   :  { %1132 = vst [vmem:[%s1765_s3 + $0x10] sm:$0xff] %v1104_v10  }
 0x155   :  { %1136 = vst [vmem:[%s1765_s3 + $0x30] sm:$0xff] %v1124_v12  }

</bundles_post_ra>
